<compile_context>
chip_gen: v6e
topology: v6e:2x2x1
jax: 0.10.0
libtpu: 0.0.40
codegen_flags: <defaults>
</compile_context>

<pallas_src>
import functools

import numpy as np
import jax
import jax.numpy as jnp
from jax import lax
from jax.experimental import pallas as pl
from jax.experimental.pallas import tpu as pltpu


_JB = 8                        # inner unroll width of the packed-triangle loop
_UNROLL_MAX_PAIRS = 528        # fully unroll the triangle when C*(C+1)/2 <= this (C <= 32)
_VMEM_BUDGET = 40 * 1024 * 1024
_VMEM_LIMIT = 48 * 1024 * 1024


def _round_up(x, m):
    return ((x + m - 1) // m) * m


def _cdiv(a, b):
    return (a + b - 1) // b


# ----------------------------------------------------------------------------
# Kernel 1: Mahalanobis distance per patch (scaled upper-triangle packed form)
# ----------------------------------------------------------------------------
def _maha_kernel(emb_ref, mean_ref, icov_ref, out_ref, delta_ref, *, C, JB, unrolled):
    """dist = sqrt(max(0, sum_{i<=j} w_ij * d_i * d_j)) on one (S,128) lane tile.

    Ref shapes (the size-1 axis is the current patch tile):
      emb_ref   : (B*C, 1, S, 128)   embedding
      mean_ref  : (C,   1, S, 128)   f32
      icov_ref  : (Ctp, 1, S, 128)   packed scaled upper triangle (+JB zero rows)
      out_ref   : (B,   1, S, 128)   f32
      delta_ref : (B,  Cp, S, 128)   f32 VMEM scratch (Cp = C [+ JB zero rows])
    """
    B = out_ref.shape[0]
    S, L = out_ref.shape[2], out_ref.shape[3]

    emb = emb_ref[...].astype(jnp.float32).reshape(B, C, S, L)
    mean = mean_ref[...].astype(jnp.float32).reshape(C, S, L)
    delta_ref[:, :C] = emb - mean[None]
    cpad = delta_ref.shape[1] - C
    if cpad > 0:
        # Zero the channel padding so packed-row chunk overruns contribute 0.
        delta_ref[:, C:] = jnp.zeros((B, cpad, S, L), jnp.float32)

    acc = jnp.zeros((B, S, L), jnp.float32)

    if unrolled:
        # Small C: fully unrolled triangle.  Delta rows are re-read from the
        # VMEM scratch so live vregs stay small.
        k = 0
        for i in range(C):
            d_i = delta_ref[:, i]
            s = jnp.zeros((B, S, L), jnp.float32)
            for j in range(i, C):
                w = icov_ref[k].astype(jnp.float32).reshape(S, L)
                s = s + w[None] * delta_ref[:, j]
                k += 1
            acc = acc + d_i * s
    else:
        # Large C: fori_loop over the row index i; the inner loop walks the
        # packed row in JB-wide unrolled chunks.  A chunk's tail may overrun
        # into the next packed row / the zero rows, but those entries are
        # multiplied by the zero-padded delta channels, so they contribute 0.
        def row_body(i, acc):
            off_i = i * C - (i * (i - 1)) // 2          # start of packed row i
            d_i = delta_ref[:, pl.ds(i, 1)][:, 0]
            n_chunks = (C - i + JB - 1) // JB

            def chunk_body(t, s):
                j0 = i + t * JB
                k0 = off_i + t * JB
                w = icov_ref[pl.ds(k0, JB)].astype(jnp.float32).reshape(JB, S, L)
                dch = delta_ref[:, pl.ds(j0, JB)]
                for r in range(JB):
                    s = s + w[r][None] * dch[:, r]
                return s

            s = lax.fori_loop(0, n_chunks, chunk_body,
                              jnp.zeros((B, S, L), jnp.float32))
            return acc + d_i * s

        acc = lax.fori_loop(0, C, row_body, acc)

    out_ref[...] = jnp.sqrt(jnp.maximum(acc, 0.0)).reshape(out_ref.shape)


@functools.lru_cache(maxsize=None)
def _build_maha_call(B, C, T, S, Ct, Ctp, Cp, JB, unrolled,
                     emb_itemsize, icov_itemsize):
    kernel = functools.partial(_maha_kernel, C=C, JB=JB, unrolled=unrolled)
    lanes = S * 128
    bytes_accessed = (B * C * T * lanes * emb_itemsize
                      + C * T * lanes * 4
                      + Ctp * T * lanes * icov_itemsize
                      + B * T * lanes * 4)
    call = pl.pallas_call(
        kernel,
        out_shape=jax.ShapeDtypeStruct((B, T, S, 128), jnp.float32),
        grid_spec=pltpu.PrefetchScalarGridSpec(
            num_scalar_prefetch=0,
            grid=(T,),
            in_specs=[
                pl.BlockSpec((B * C, 1, S, 128), lambda p: (0, p, 0, 0)),
                pl.BlockSpec((C, 1, S, 128), lambda p: (0, p, 0, 0)),
                pl.BlockSpec((Ctp, 1, S, 128), lambda p: (0, p, 0, 0)),
            ],
            out_specs=pl.BlockSpec((B, 1, S, 128), lambda p: (0, p, 0, 0)),
            scratch_shapes=[pltpu.VMEM((B, Cp, S, 128), jnp.float32)],
        ),
        # Patch tiles are independent -> "parallel" (v7x megacore can split).
        compiler_params=pltpu.CompilerParams(
            dimension_semantics=("parallel",),
            vmem_limit_bytes=_VMEM_LIMIT),
        cost_estimate=pl.CostEstimate(
            flops=int(3 * B * Ct * T * lanes),
            transcendentals=int(B * T * lanes),
            bytes_accessed=int(bytes_accessed)),
    )
    return jax.jit(call)


# ----------------------------------------------------------------------------
# Kernel 2: fused (bilinear upsample + Gaussian blur) as out_b = Ay @ d_b @ Ax^T
# ----------------------------------------------------------------------------
def _resize_blur_kernel(d_ref, axt_ref, ayt_ref, o_ref):
    """Two wide MXU matmuls per block of images (no per-image loop)."""
    bt, H, W = d_ref.shape
    Wo_pad = axt_ref.shape[1]
    Ho = ayt_ref.shape[1]
    d = d_ref[...].astype(jnp.float32)
    # Column pass, batched over (image, row):  (bt*H, W) @ (W, Wo_pad)
    t = jnp.dot(d.reshape(bt * H, W), axt_ref[...],
                preferred_element_type=jnp.float32)
    # Row pass, batched over (image, out column): (bt*Wo_pad, H) @ (H, Ho).
    # The swapaxes runs on the XLU, off the MXU critical path.
    t = jnp.swapaxes(t.reshape(bt, H, Wo_pad), 1, 2)          # (bt, Wo_pad, H)
    u = jnp.dot(t.reshape(bt * Wo_pad, H), ayt_ref[...],
                preferred_element_type=jnp.float32)           # (bt*Wo_pad, Ho)
    o_ref[...] = jnp.swapaxes(u.reshape(bt, Wo_pad, Ho), 1, 2)  # (bt, Ho, Wo_pad)


@functools.lru_cache(maxsize=None)
def _build_resize_blur_call(Bp, bt, H, W, Ho, Wo_pad):
    call = pl.pallas_call(
        _resize_blur_kernel,
        out_shape=jax.ShapeDtypeStruct((Bp, Ho, Wo_pad), jnp.float32),
        grid_spec=pltpu.PrefetchScalarGridSpec(
            num_scalar_prefetch=0,
            grid=(Bp // bt,),
            in_specs=[
                pl.BlockSpec((bt, H, W), lambda b: (b, 0, 0)),
                pl.BlockSpec((W, Wo_pad), lambda b: (0, 0)),
                pl.BlockSpec((H, Ho), lambda b: (0, 0)),
            ],
            out_specs=pl.BlockSpec((bt, Ho, Wo_pad), lambda b: (b, 0, 0)),
        ),
        compiler_params=pltpu.CompilerParams(
            dimension_semantics=("parallel",),
            vmem_limit_bytes=_VMEM_LIMIT),
        cost_estimate=pl.CostEstimate(
            flops=int(2 * Bp * (H * W * Wo_pad + Wo_pad * H * Ho)),
            transcendentals=0,
            bytes_accessed=int(4 * (Bp * H * W + Bp * Ho * Wo_pad
                                    + W * Wo_pad + H * Ho))),
    )
    return jax.jit(call)


# ----------------------------------------------------------------------------
# Host-side exact linear operators for bilinear resize and Gaussian blur
# ----------------------------------------------------------------------------
def bilinear_resize_matrix(out_size, in_size):
    # Matches F.interpolate(mode="bilinear", align_corners=False) per axis.
    scale = in_size / out_size
    o = np.arange(out_size)
    src = (o + 0.5) * scale - 0.5
    src = np.where(src < 0.0, 0.0, src)
    i0 = np.floor(src).astype(np.int64)
    lam = src - i0
    i1 = np.minimum(i0 + 1, in_size - 1)
    i0 = np.minimum(i0, in_size - 1)
    m = np.zeros((out_size, in_size), np.float64)
    m[o, i0] += 1.0 - lam
    m[o, i1] += lam
    return m


def gaussian_blur_matrix(n, kernel_size, sigma):
    # Matches GaussianBlur2d: normalized Gaussian kernel, "same" reflect padding.
    x = np.arange(kernel_size, dtype=np.float64) - kernel_size // 2
    g = np.exp(-(x ** 2) / (2.0 * float(sigma) ** 2))
    g = g / g.sum()
    pad = (kernel_size - 1) // 2
    assert pad <= n - 1, "reflect padding requires pad <= size - 1"
    m = np.zeros((n, n), np.float64)
    for out_i in range(n):
        for k in range(kernel_size):
            idx = out_i - pad + k
            if idx < 0:
                idx = -idx
            if idx >= n:
                idx = 2 * n - 2 - idx
            m[out_i, idx] += g[k]
    return m


# ----------------------------------------------------------------------------
# Generator
# ----------------------------------------------------------------------------
class AnomalyMapGenerator:
    """Pallas-TPU implementation of the PADIM/PEIF anomaly map generator.

    icov_dtype: storage dtype of the packed inverse covariance stream
    (bfloat16 by default -- it dominates HBM traffic; accumulation is f32).
    Use jnp.float32 for bit-faithful distances.
    """

    def __init__(self, image_size, sigma=4, icov_dtype=jnp.bfloat16):
        self.image_size = tuple(int(s) for s in image_size)
        self.sigma = sigma
        self.kernel_size = 2 * int(4.0 * sigma + 0.5) + 1   # 33 for sigma=4
        self.icov_dtype = np.dtype(icov_dtype)
        Ho, Wo = self.image_size
        self._gy64 = gaussian_blur_matrix(Ho, self.kernel_size, sigma)
        self._gx64 = gaussian_blur_matrix(Wo, self.kernel_size, sigma)
        self._resize_cache = {}    # (H, W) -> (ayt, axt, Wo_pad)
        self._plan_cache = {}      # (B, C, P, icov dtype) -> tiling plan
        self._stats_cache = {}     # id-keyed packed inv_covariance / mean

    # ---------------- kernel-1 tiling plan ----------------
    def _plan(self, B, C, P):
        key = (B, C, P, str(self.icov_dtype))
        plan = self._plan_cache.get(key)
        if plan is not None:
            return plan
        Ct = C * (C + 1) // 2
        unrolled = Ct <= _UNROLL_MAX_PAIRS
        JB = _JB
        Ctp = Ct if unrolled else Ct + JB
        Cp = C if unrolled else C + JB
        n128 = _cdiv(P, 128)
        Pp = n128 * 128
        icov_bytes = self.icov_dtype.itemsize

        def vmem_need(S):
            row = _round_up(S, 8) * 128     # VMEM tiles pad the sublane dim to 8
            need = 2 * row * (Ctp * icov_bytes + B * C * 4 + C * 4 + B * 4)
            need += row * B * Cp * 4        # delta scratch (single buffer)
            return need

        def density(S):
            return S / (8 * _cdiv(S, 8))

        divisors = [d for d in range(1, n128 + 1) if n128 % d == 0]
        feasible = [d for d in divisors if vmem_need(d) <= _VMEM_BUDGET]
        if not feasible:
            # TODO(synk): tile the packed-channel (Ct) axis for very large C
            # (e.g. WideResNet C=550), where even one 128-lane slab of the
            # packed inverse covariance exceeds the VMEM budget.
            lo = min(vmem_need(d) for d in divisors)
            feasible = [d for d in divisors if vmem_need(d) == lo]
        S = max(feasible, key=lambda d: (density(d), -d))
        plan = dict(B=B, C=C, P=P, Ct=Ct, Ctp=Ctp, Cp=Cp, JB=JB,
                    unrolled=unrolled, Pp=Pp, S=S, T=n128 // S)
        self._plan_cache[key] = plan
        return plan

    # ------------- cached statistics preprocessing (fixed per model) -------------
    def _packed_icov(self, inv_covariance, plan):
        key = ("icov", id(inv_covariance), plan["C"], plan["P"], plan["S"],
               plan["Ctp"], str(self.icov_dtype))
        hit = self._stats_cache.get(key)
        if hit is not None and hit[0] is inv_covariance:
            return hit[1]
        C, P, Pp, Ct, Ctp, S, T = (plan[k] for k in
                                   ("C", "P", "Pp", "Ct", "Ctp", "S", "T"))
        iu, ju = np.triu_indices(C)
        scale = jnp.asarray(np.where(iu == ju, 1.0, 2.0).astype(np.float32))
        icov = inv_covariance.astype(jnp.float32)
        # d^T A d == d^T sym(A) d exactly, so symmetrizing preserves the math.
        icov = 0.5 * (icov + jnp.swapaxes(icov, -1, -2))
        packed = jnp.transpose(icov[:, iu, ju] * scale[None, :])      # (Ct, P)
        packed = jnp.pad(packed, ((0, Ctp - Ct), (0, Pp - P)))
        packed = packed.reshape(Ctp, T, S, 128).astype(self.icov_dtype)
        self._stats_cache[key] = (inv_covariance, packed)
        return packed

    def _packed_mean(self, mean, plan):
        key = ("mean", id(mean), plan["C"], plan["P"], plan["S"])
        hit = self._stats_cache.get(key)
        if hit is not None and hit[0] is mean:
            return hit[1]
        C, P, Pp, S, T = (plan[k] for k in ("C", "P", "Pp", "S", "T"))
        mean_r = jnp.reshape(mean, (C, P)).astype(jnp.float32)
        mean_r = jnp.pad(mean_r, ((0, 0), (0, Pp - P))).reshape(C, T, S, 128)
        self._stats_cache[key] = (mean, mean_r)
        return mean_r

    # ------------- composed upsample+blur operators (cached per H, W) -------------
    def _composed_matrices(self, H, W):
        key = (H, W)
        hit = self._resize_cache.get(key)
        if hit is not None:
            return hit
        Ho, Wo = self.image_size
        ay = (self._gy64 @ bilinear_resize_matrix(Ho, H)).astype(np.float32)
        ax = (self._gx64 @ bilinear_resize_matrix(Wo, W)).astype(np.float32)
        Wo_pad = _round_up(Wo, 128)                 # lane-dense (unmasked) stores
        ax_pad = np.zeros((Wo_pad, W), np.float32)
        ax_pad[:Wo] = ax
        ayt = jnp.asarray(ay.T)                     # (H, Ho)
        axt = jnp.asarray(ax_pad.T)                 # (W, Wo_pad)
        self._resize_cache[key] = (ayt, axt, Wo_pad)
        return ayt, axt, Wo_pad

    @staticmethod
    def _select_bt(B, H, W, Ho, Wo_pad):
        # VMEM per image: double-buffered in/out blocks + matmul intermediates.
        per_img = 4 * (2 * H * W + 2 * Ho * Wo_pad + 2 * (H * Wo_pad + Wo_pad * Ho))
        weights = 8 * (W * Wo_pad + H * Ho)
        cap = max(1, (_VMEM_BUDGET - weights) // max(per_img, 1))
        # bt <= ceil(B/2) keeps the grid >= 2 so both v7x TensorCores are fed.
        return int(max(1, min(64, cap, _cdiv(B, 2))))

    # ---------------- forward ----------------
    def __call__(self, *, embedding, mean, inv_covariance):
        B, C, H, W = embedding.shape
        P = H * W
        plan = self._plan(B, C, P)
        Pp, S, T = plan["Pp"], plan["S"], plan["T"]

        icov_r = self._packed_icov(inv_covariance, plan)   # cached across calls
        mean_r = self._packed_mean(mean, plan)             # cached across calls

        emb = embedding.reshape(B, C, P)
        if Pp != P:
            emb = jnp.pad(emb, ((0, 0), (0, 0), (0, Pp - P)))
        emb_r = emb.reshape(B * C, T, S, 128)

        maha = _build_maha_call(B, C, T, S, plan["Ct"], plan["Ctp"], plan["Cp"],
                                plan["JB"], plan["unrolled"],
                                int(emb_r.dtype.itemsize),
                                int(self.icov_dtype.itemsize))
        dist = maha(emb_r, mean_r, icov_r)                 # (B, T, S, 128)
        dist = dist.reshape(B, Pp)[:, :P].reshape(B, H, W)

        Ho, Wo = self.image_size
        ayt, axt, Wo_pad = self._composed_matrices(H, W)
        bt = self._select_bt(B, H, W, Ho, Wo_pad)
        Bp = _round_up(B, bt)
        if Bp != B:
            dist = jnp.pad(dist, ((0, Bp - B), (0, 0), (0, 0)))
        blur = _build_resize_blur_call(Bp, bt, H, W, Ho, Wo_pad)
        out = blur(dist, axt, ayt)                         # (Bp, Ho, Wo_pad)
        return out[:B, None, :, :Wo]                       # NCHW (B, 1, Ho, Wo)


# ----------------------------------------------------------------------------
# Pure-JAX reference (unfused operators, full inv_covariance) for validation.
# ----------------------------------------------------------------------------
def reference(embedding, mean, inv_covariance, image_size, kernel_size, sigma):
    hp = jax.lax.Precision.HIGHEST
    B, C, H, W = embedding.shape
    P = H * W
    Ho, Wo = image_size
    e = embedding.reshape(B, C, P).astype(jnp.float32)
    m = jnp.reshape(mean, (C, P)).astype(jnp.float32)
    delta = jnp.transpose(e - m[None], (2, 0, 1))                      # (P, B, C)
    d = jnp.einsum("pbi,pij,pbj->bp", delta,
                   inv_covariance.astype(jnp.float32), delta, precision=hp)
    d = jnp.sqrt(jnp.maximum(d, 0.0)).reshape(B, H, W)
    wy = jnp.asarray(bilinear_resize_matrix(Ho, H).astype(np.float32))
    wx = jnp.asarray(bilinear_resize_matrix(Wo, W).astype(np.float32))
    gy = jnp.asarray(gaussian_blur_matrix(Ho, kernel_size, sigma).astype(np.float32))
    gx = jnp.asarray(gaussian_blur_matrix(Wo, kernel_size, sigma).astype(np.float32))
    up = jnp.einsum("oh,bhw,qw->boq", wy, d, wx, precision=hp)
    sm = jnp.einsum("oh,bhw,qw->boq", gy, up, gx, precision=hp)
    return sm[:, None]


if __name__ == "__main__":
    key = jax.random.PRNGKey(0)

    def make_inputs(k, B, C, H, W):
        k1, k2, k3 = jax.random.split(k, 3)
        P = H * W
        embedding = jax.random.normal(k1, (B, C, H, W), dtype=jnp.float32)
        mean = jax.random.normal(k2, (C, P), dtype=jnp.float32)
        a = jax.random.normal(k3, (P, C, C), dtype=jnp.float32)
        inv_cov = (a @ jnp.swapaxes(a, -1, -2)) / C + 0.1 * jnp.eye(C, dtype=jnp.float32)[None]
        return embedding, mean, inv_cov

    k1, k2 = jax.random.split(key)

    # Case 1: small C -> fully-unrolled packed path, f32 icov (tight check).
    B, C, H, W = 2, 8, 16, 16
    image_size = (64, 64)
    emb, mu, icov = make_inputs(k1, B, C, H, W)
    gen = AnomalyMapGenerator(image_size=image_size, sigma=4, icov_dtype=jnp.float32)
    out = jax.block_until_ready(gen(embedding=emb, mean=mu, inv_covariance=icov))
    ref = reference(emb, mu, icov, image_size, gen.kernel_size, gen.sigma)
    assert out.shape == (B, 1, image_size[0], image_size[1])
    assert bool(jnp.all(jnp.isfinite(out)))
    np.testing.assert_allclose(np.asarray(out), np.asarray(ref), rtol=5e-3, atol=5e-3)
    # Second call hits the cached statistics / cached compiled kernels.
    out2 = jax.block_until_ready(gen(embedding=emb, mean=mu, inv_covariance=icov))
    np.testing.assert_array_equal(np.asarray(out2), np.asarray(out))

    # Case 2: larger C -> fori_loop packed path, non-square output, f32 icov.
    B2, C2, H2, W2 = 2, 40, 14, 14
    image_size2 = (64, 48)
    emb2, mu2, icov2 = make_inputs(k2, B2, C2, H2, W2)
    gen2 = AnomalyMapGenerator(image_size=image_size2, sigma=4, icov_dtype=jnp.float32)
    out_b = jax.block_until_ready(gen2(embedding=emb2, mean=mu2, inv_covariance=icov2))
    ref2 = reference(emb2, mu2, icov2, image_size2, gen2.kernel_size, gen2.sigma)
    assert out_b.shape == (B2, 1, image_size2[0], image_size2[1])
    assert bool(jnp.all(jnp.isfinite(out_b)))
    np.testing.assert_allclose(np.asarray(out_b), np.asarray(ref2), rtol=5e-3, atol=5e-3)

    # Case 3: same config, bf16-streamed inverse covariance (default mode).
    gen3 = AnomalyMapGenerator(image_size=image_size2, sigma=4)   # bf16 icov
    out_c = jax.block_until_ready(gen3(embedding=emb2, mean=mu2, inv_covariance=icov2))
    assert bool(jnp.all(jnp.isfinite(out_c)))
    np.testing.assert_allclose(np.asarray(out_c), np.asarray(ref2), rtol=5e-2, atol=5e-2)

    print("KERNEL_OK")
</pallas_src>

<mosaic_0001>
module attributes {stable_mosaic.version = 11 : i64} {
  func.func @_maha_kernel(%arg0: i32, %arg1: memref<16x1x2x128xf32, #tpu.memory_space<vmem>>, %arg2: memref<8x1x2x128xf32, #tpu.memory_space<vmem>>, %arg3: memref<36x1x2x128xf32, #tpu.memory_space<vmem>>, %arg4: memref<2x1x2x128xf32, #tpu.memory_space<vmem>>, %arg5: memref<2x8x2x128xf32, #tpu.memory_space<vmem>>) attributes {dimension_semantics = [#tpu.dimension_semantics<parallel>], iteration_bounds = array<i64: 1>, scalar_prefetch = 0 : i64, scratch_operands = 1 : i64, tpu.core_type = #tpu.core_type<tc>, window_params = [{transform_indices = @transform_0, window_bounds = array<i64: 16, 1, 2, 128>}, {transform_indices = @transform_1, window_bounds = array<i64: 8, 1, 2, 128>}, {transform_indices = @transform_2, window_bounds = array<i64: 36, 1, 2, 128>}, {transform_indices = @transform_3, window_bounds = array<i64: 2, 1, 2, 128>}]} {
    %c0 = arith.constant 0 : index
    %c0_0 = arith.constant 0 : index
    %c0_1 = arith.constant 0 : index
    %c0_2 = arith.constant 0 : index
    %0 = vector.load %arg1[%c0, %c0_0, %c0_1, %c0_2] : memref<16x1x2x128xf32, #tpu.memory_space<vmem>>, vector<16x1x2x128xf32>
    %1 = vector.shape_cast %0 : vector<16x1x2x128xf32> to vector<2x8x2x128xf32>
    %c0_3 = arith.constant 0 : index
    %c0_4 = arith.constant 0 : index
    %c0_5 = arith.constant 0 : index
    %c0_6 = arith.constant 0 : index
    %2 = vector.load %arg2[%c0_3, %c0_4, %c0_5, %c0_6] : memref<8x1x2x128xf32, #tpu.memory_space<vmem>>, vector<8x1x2x128xf32>
    %3 = vector.shape_cast %2 : vector<8x1x2x128xf32> to vector<8x2x128xf32>
    %4 = vector.shape_cast %3 : vector<8x2x128xf32> to vector<1x8x2x128xf32>
    %5 = vector.broadcast %4 : vector<1x8x2x128xf32> to vector<2x8x2x128xf32>
    %6 = arith.subf %1, %5 : vector<2x8x2x128xf32>
    %c0_7 = arith.constant 0 : index
    %c0_8 = arith.constant 0 : index
    %c0_9 = arith.constant 0 : index
    %c0_10 = arith.constant 0 : index
    %7 = vector.load %arg5[%c0_7, %c0_8, %c0_9, %c0_10] : memref<2x8x2x128xf32, #tpu.memory_space<vmem>>, vector<2x8x2x128xf32>
    tpu.vector_store %arg5[%c0_7, %c0_8, %c0_9, %c0_10], %6 {strides = array<i32>} : memref<2x8x2x128xf32, #tpu.memory_space<vmem>>, vector<2x8x2x128xf32>,
    %cst = arith.constant 0.000000e+00 : f32
    %8 = vector.broadcast %cst : f32 to vector<2x2x128xf32>
    %c0_11 = arith.constant 0 : index
    %c0_12 = arith.constant 0 : index
    %c0_13 = arith.constant 0 : index
    %c0_14 = arith.constant 0 : index
    %9 = vector.load %arg5[%c0_11, %c0_12, %c0_13, %c0_14] : memref<2x8x2x128xf32, #tpu.memory_space<vmem>>, vector<2x1x2x128xf32>
    %10 = vector.shape_cast %9 : vector<2x1x2x128xf32> to vector<2x2x128xf32>
    %cst_15 = arith.constant 0.000000e+00 : f32
    %11 = vector.broadcast %cst_15 : f32 to vector<2x2x128xf32>
    %c0_16 = arith.constant 0 : index
    %c0_17 = arith.constant 0 : index
    %c0_18 = arith.constant 0 : index
    %c0_19 = arith.constant 0 : index
    %12 = vector.load %arg3[%c0_16, %c0_17, %c0_18, %c0_19] : memref<36x1x2x128xf32, #tpu.memory_space<vmem>>, vector<1x1x2x128xf32>
    %13 = vector.shape_cast %12 : vector<1x1x2x128xf32> to vector<1x2x128xf32>
    %14 = vector.shape_cast %13 : vector<1x2x128xf32> to vector<2x128xf32>
    %15 = vector.shape_cast %14 : vector<2x128xf32> to vector<1x2x128xf32>
    %c0_20 = arith.constant 0 : index
    %c0_21 = arith.constant 0 : index
    %c0_22 = arith.constant 0 : index
    %c0_23 = arith.constant 0 : index
    %16 = vector.load %arg5[%c0_20, %c0_21, %c0_22, %c0_23] : memref<2x8x2x128xf32, #tpu.memory_space<vmem>>, vector<2x1x2x128xf32>
    %17 = vector.shape_cast %16 : vector<2x1x2x128xf32> to vector<2x2x128xf32>
    %18 = vector.broadcast %15 : vector<1x2x128xf32> to vector<2x2x128xf32>
    %19 = arith.mulf %18, %17 : vector<2x2x128xf32>
    %20 = arith.addf %11, %19 : vector<2x2x128xf32>
    %c1 = arith.constant 1 : index
    %c0_24 = arith.constant 0 : index
    %c0_25 = arith.constant 0 : index
    %c0_26 = arith.constant 0 : index
    %21 = vector.load %arg3[%c1, %c0_24, %c0_25, %c0_26] : memref<36x1x2x128xf32, #tpu.memory_space<vmem>>, vector<1x1x2x128xf32>
    %22 = vector.shape_cast %21 : vector<1x1x2x128xf32> to vector<1x2x128xf32>
    %23 = vector.shape_cast %22 : vector<1x2x128xf32> to vector<2x128xf32>
    %24 = vector.shape_cast %23 : vector<2x128xf32> to vector<1x2x128xf32>
    %c0_27 = arith.constant 0 : index
    %c1_28 = arith.constant 1 : index
    %c0_29 = arith.constant 0 : index
    %c0_30 = arith.constant 0 : index
    %25 = vector.load %arg5[%c0_27, %c1_28, %c0_29, %c0_30] : memref<2x8x2x128xf32, #tpu.memory_space<vmem>>, vector<2x1x2x128xf32>
    %26 = vector.shape_cast %25 : vector<2x1x2x128xf32> to vector<2x2x128xf32>
    %27 = vector.broadcast %24 : vector<1x2x128xf32> to vector<2x2x128xf32>
    %28 = arith.mulf %27, %26 : vector<2x2x128xf32>
    %29 = arith.addf %20, %28 : vector<2x2x128xf32>
    %c2 = arith.constant 2 : index
    %c0_31 = arith.constant 0 : index
    %c0_32 = arith.constant 0 : index
    %c0_33 = arith.constant 0 : index
    %30 = vector.load %arg3[%c2, %c0_31, %c0_32, %c0_33] : memref<36x1x2x128xf32, #tpu.memory_space<vmem>>, vector<1x1x2x128xf32>
    %31 = vector.shape_cast %30 : vector<1x1x2x128xf32> to vector<1x2x128xf32>
    %32 = vector.shape_cast %31 : vector<1x2x128xf32> to vector<2x128xf32>
    %33 = vector.shape_cast %32 : vector<2x128xf32> to vector<1x2x128xf32>
    %c0_34 = arith.constant 0 : index
    %c2_35 = arith.constant 2 : index
    %c0_36 = arith.constant 0 : index
    %c0_37 = arith.constant 0 : index
    %34 = vector.load %arg5[%c0_34, %c2_35, %c0_36, %c0_37] : memref<2x8x2x128xf32, #tpu.memory_space<vmem>>, vector<2x1x2x128xf32>
    %35 = vector.shape_cast %34 : vector<2x1x2x128xf32> to vector<2x2x128xf32>
    %36 = vector.broadcast %33 : vector<1x2x128xf32> to vector<2x2x128xf32>
    %37 = arith.mulf %36, %35 : vector<2x2x128xf32>
    %38 = arith.addf %29, %37 : vector<2x2x128xf32>
    %c3 = arith.constant 3 : index
    %c0_38 = arith.constant 0 : index
    %c0_39 = arith.constant 0 : index
    %c0_40 = arith.constant 0 : index
    %39 = vector.load %arg3[%c3, %c0_38, %c0_39, %c0_40] : memref<36x1x2x128xf32, #tpu.memory_space<vmem>>, vector<1x1x2x128xf32>
    %40 = vector.shape_cast %39 : vector<1x1x2x128xf32> to vector<1x2x128xf32>
    %41 = vector.shape_cast %40 : vector<1x2x128xf32> to vector<2x128xf32>
    %42 = vector.shape_cast %41 : vector<2x128xf32> to vector<1x2x128xf32>
    %c0_41 = arith.constant 0 : index
    %c3_42 = arith.constant 3 : index
    %c0_43 = arith.constant 0 : index
    %c0_44 = arith.constant 0 : index
    %43 = vector.load %arg5[%c0_41, %c3_42, %c0_43, %c0_44] : memref<2x8x2x128xf32, #tpu.memory_space<vmem>>, vector<2x1x2x128xf32>
    %44 = vector.shape_cast %43 : vector<2x1x2x128xf32> to vector<2x2x128xf32>
    %45 = vector.broadcast %42 : vector<1x2x128xf32> to vector<2x2x128xf32>
    %46 = arith.mulf %45, %44 : vector<2x2x128xf32>
    %47 = arith.addf %38, %46 : vector<2x2x128xf32>
    %c4 = arith.constant 4 : index
    %c0_45 = arith.constant 0 : index
    %c0_46 = arith.constant 0 : index
    %c0_47 = arith.constant 0 : index
    %48 = vector.load %arg3[%c4, %c0_45, %c0_46, %c0_47] : memref<36x1x2x128xf32, #tpu.memory_space<vmem>>, vector<1x1x2x128xf32>
    %49 = vector.shape_cast %48 : vector<1x1x2x128xf32> to vector<1x2x128xf32>
    %50 = vector.shape_cast %49 : vector<1x2x128xf32> to vector<2x128xf32>
    %51 = vector.shape_cast %50 : vector<2x128xf32> to vector<1x2x128xf32>
    %c0_48 = arith.constant 0 : index
    %c4_49 = arith.constant 4 : index
    %c0_50 = arith.constant 0 : index
    %c0_51 = arith.constant 0 : index
    %52 = vector.load %arg5[%c0_48, %c4_49, %c0_50, %c0_51] : memref<2x8x2x128xf32, #tpu.memory_space<vmem>>, vector<2x1x2x128xf32>
    %53 = vector.shape_cast %52 : vector<2x1x2x128xf32> to vector<2x2x128xf32>
    %54 = vector.broadcast %51 : vector<1x2x128xf32> to vector<2x2x128xf32>
    %55 = arith.mulf %54, %53 : vector<2x2x128xf32>
    %56 = arith.addf %47, %55 : vector<2x2x128xf32>
    %c5 = arith.constant 5 : index
    %c0_52 = arith.constant 0 : index
    %c0_53 = arith.constant 0 : index
    %c0_54 = arith.constant 0 : index
    %57 = vector.load %arg3[%c5, %c0_52, %c0_53, %c0_54] : memref<36x1x2x128xf32, #tpu.memory_space<vmem>>, vector<1x1x2x128xf32>
    %58 = vector.shape_cast %57 : vector<1x1x2x128xf32> to vector<1x2x128xf32>
    %59 = vector.shape_cast %58 : vector<1x2x128xf32> to vector<2x128xf32>
    %60 = vector.shape_cast %59 : vector<2x128xf32> to vector<1x2x128xf32>
    %c0_55 = arith.constant 0 : index
    %c5_56 = arith.constant 5 : index
    %c0_57 = arith.constant 0 : index
    %c0_58 = arith.constant 0 : index
    %61 = vector.load %arg5[%c0_55, %c5_56, %c0_57, %c0_58] : memref<2x8x2x128xf32, #tpu.memory_space<vmem>>, vector<2x1x2x128xf32>
    %62 = vector.shape_cast %61 : vector<2x1x2x128xf32> to vector<2x2x128xf32>
    %63 = vector.broadcast %60 : vector<1x2x128xf32> to vector<2x2x128xf32>
    %64 = arith.mulf %63, %62 : vector<2x2x128xf32>
    %65 = arith.addf %56, %64 : vector<2x2x128xf32>
    %c6 = arith.constant 6 : index
    %c0_59 = arith.constant 0 : index
    %c0_60 = arith.constant 0 : index
    %c0_61 = arith.constant 0 : index
    %66 = vector.load %arg3[%c6, %c0_59, %c0_60, %c0_61] : memref<36x1x2x128xf32, #tpu.memory_space<vmem>>, vector<1x1x2x128xf32>
    %67 = vector.shape_cast %66 : vector<1x1x2x128xf32> to vector<1x2x128xf32>
    %68 = vector.shape_cast %67 : vector<1x2x128xf32> to vector<2x128xf32>
    %69 = vector.shape_cast %68 : vector<2x128xf32> to vector<1x2x128xf32>
    %c0_62 = arith.constant 0 : index
    %c6_63 = arith.constant 6 : index
    %c0_64 = arith.constant 0 : index
    %c0_65 = arith.constant 0 : index
    %70 = vector.load %arg5[%c0_62, %c6_63, %c0_64, %c0_65] : memref<2x8x2x128xf32, #tpu.memory_space<vmem>>, vector<2x1x2x128xf32>
    %71 = vector.shape_cast %70 : vector<2x1x2x128xf32> to vector<2x2x128xf32>
    %72 = vector.broadcast %69 : vector<1x2x128xf32> to vector<2x2x128xf32>
    %73 = arith.mulf %72, %71 : vector<2x2x128xf32>
    %74 = arith.addf %65, %73 : vector<2x2x128xf32>
    %c7 = arith.constant 7 : index
    %c0_66 = arith.constant 0 : index
    %c0_67 = arith.constant 0 : index
    %c0_68 = arith.constant 0 : index
    %75 = vector.load %arg3[%c7, %c0_66, %c0_67, %c0_68] : memref<36x1x2x128xf32, #tpu.memory_space<vmem>>, vector<1x1x2x128xf32>
    %76 = vector.shape_cast %75 : vector<1x1x2x128xf32> to vector<1x2x128xf32>
    %77 = vector.shape_cast %76 : vector<1x2x128xf32> to vector<2x128xf32>
    %78 = vector.shape_cast %77 : vector<2x128xf32> to vector<1x2x128xf32>
    %c0_69 = arith.constant 0 : index
    %c7_70 = arith.constant 7 : index
    %c0_71 = arith.constant 0 : index
    %c0_72 = arith.constant 0 : index
    %79 = vector.load %arg5[%c0_69, %c7_70, %c0_71, %c0_72] : memref<2x8x2x128xf32, #tpu.memory_space<vmem>>, vector<2x1x2x128xf32>
    %80 = vector.shape_cast %79 : vector<2x1x2x128xf32> to vector<2x2x128xf32>
    %81 = vector.broadcast %78 : vector<1x2x128xf32> to vector<2x2x128xf32>
    %82 = arith.mulf %81, %80 : vector<2x2x128xf32>
    %83 = arith.addf %74, %82 : vector<2x2x128xf32>
    %84 = arith.mulf %10, %83 : vector<2x2x128xf32>
    %85 = arith.addf %8, %84 : vector<2x2x128xf32>
    %c0_73 = arith.constant 0 : index
    %c1_74 = arith.constant 1 : index
    %c0_75 = arith.constant 0 : index
    %c0_76 = arith.constant 0 : index
    %86 = vector.load %arg5[%c0_73, %c1_74, %c0_75, %c0_76] : memref<2x8x2x128xf32, #tpu.memory_space<vmem>>, vector<2x1x2x128xf32>
    %87 = vector.shape_cast %86 : vector<2x1x2x128xf32> to vector<2x2x128xf32>
    %cst_77 = arith.constant 0.000000e+00 : f32
    %88 = vector.broadcast %cst_77 : f32 to vector<2x2x128xf32>
    %c8 = arith.constant 8 : index
    %c0_78 = arith.constant 0 : index
    %c0_79 = arith.constant 0 : index
    %c0_80 = arith.constant 0 : index
    %89 = vector.load %arg3[%c8, %c0_78, %c0_79, %c0_80] : memref<36x1x2x128xf32, #tpu.memory_space<vmem>>, vector<1x1x2x128xf32>
    %90 = vector.shape_cast %89 : vector<1x1x2x128xf32> to vector<1x2x128xf32>
    %91 = vector.shape_cast %90 : vector<1x2x128xf32> to vector<2x128xf32>
    %92 = vector.shape_cast %91 : vector<2x128xf32> to vector<1x2x128xf32>
    %c0_81 = arith.constant 0 : index
    %c1_82 = arith.constant 1 : index
    %c0_83 = arith.constant 0 : index
    %c0_84 = arith.constant 0 : index
    %93 = vector.load %arg5[%c0_81, %c1_82, %c0_83, %c0_84] : memref<2x8x2x128xf32, #tpu.memory_space<vmem>>, vector<2x1x2x128xf32>
    %94 = vector.shape_cast %93 : vector<2x1x2x128xf32> to vector<2x2x128xf32>
    %95 = vector.broadcast %92 : vector<1x2x128xf32> to vector<2x2x128xf32>
    %96 = arith.mulf %95, %94 : vector<2x2x128xf32>
    %97 = arith.addf %88, %96 : vector<2x2x128xf32>
    %c9 = arith.constant 9 : index
    %c0_85 = arith.constant 0 : index
    %c0_86 = arith.constant 0 : index
    %c0_87 = arith.constant 0 : index
    %98 = vector.load %arg3[%c9, %c0_85, %c0_86, %c0_87] : memref<36x1x2x128xf32, #tpu.memory_space<vmem>>, vector<1x1x2x128xf32>
    %99 = vector.shape_cast %98 : vector<1x1x2x128xf32> to vector<1x2x128xf32>
    %100 = vector.shape_cast %99 : vector<1x2x128xf32> to vector<2x128xf32>
    %101 = vector.shape_cast %100 : vector<2x128xf32> to vector<1x2x128xf32>
    %c0_88 = arith.constant 0 : index
    %c2_89 = arith.constant 2 : index
    %c0_90 = arith.constant 0 : index
    %c0_91 = arith.constant 0 : index
    %102 = vector.load %arg5[%c0_88, %c2_89, %c0_90, %c0_91] : memref<2x8x2x128xf32, #tpu.memory_space<vmem>>, vector<2x1x2x128xf32>
    %103 = vector.shape_cast %102 : vector<2x1x2x128xf32> to vector<2x2x128xf32>
    %104 = vector.broadcast %101 : vector<1x2x128xf32> to vector<2x2x128xf32>
    %105 = arith.mulf %104, %103 : vector<2x2x128xf32>
    %106 = arith.addf %97, %105 : vector<2x2x128xf32>
    %c10 = arith.constant 10 : index
    %c0_92 = arith.constant 0 : index
    %c0_93 = arith.constant 0 : index
    %c0_94 = arith.constant 0 : index
    %107 = vector.load %arg3[%c10, %c0_92, %c0_93, %c0_94] : memref<36x1x2x128xf32, #tpu.memory_space<vmem>>, vector<1x1x2x128xf32>
    %108 = vector.shape_cast %107 : vector<1x1x2x128xf32> to vector<1x2x128xf32>
    %109 = vector.shape_cast %108 : vector<1x2x128xf32> to vector<2x128xf32>
    %110 = vector.shape_cast %109 : vector<2x128xf32> to vector<1x2x128xf32>
    %c0_95 = arith.constant 0 : index
    %c3_96 = arith.constant 3 : index
    %c0_97 = arith.constant 0 : index
    %c0_98 = arith.constant 0 : index
    %111 = vector.load %arg5[%c0_95, %c3_96, %c0_97, %c0_98] : memref<2x8x2x128xf32, #tpu.memory_space<vmem>>, vector<2x1x2x128xf32>
    %112 = vector.shape_cast %111 : vector<2x1x2x128xf32> to vector<2x2x128xf32>
    %113 = vector.broadcast %110 : vector<1x2x128xf32> to vector<2x2x128xf32>
    %114 = arith.mulf %113, %112 : vector<2x2x128xf32>
    %115 = arith.addf %106, %114 : vector<2x2x128xf32>
    %c11 = arith.constant 11 : index
    %c0_99 = arith.constant 0 : index
    %c0_100 = arith.constant 0 : index
    %c0_101 = arith.constant 0 : index
    %116 = vector.load %arg3[%c11, %c0_99, %c0_100, %c0_101] : memref<36x1x2x128xf32, #tpu.memory_space<vmem>>, vector<1x1x2x128xf32>
    %117 = vector.shape_cast %116 : vector<1x1x2x128xf32> to vector<1x2x128xf32>
    %118 = vector.shape_cast %117 : vector<1x2x128xf32> to vector<2x128xf32>
    %119 = vector.shape_cast %118 : vector<2x128xf32> to vector<1x2x128xf32>
    %c0_102 = arith.constant 0 : index
    %c4_103 = arith.constant 4 : index
    %c0_104 = arith.constant 0 : index
    %c0_105 = arith.constant 0 : index
    %120 = vector.load %arg5[%c0_102, %c4_103, %c0_104, %c0_105] : memref<2x8x2x128xf32, #tpu.memory_space<vmem>>, vector<2x1x2x128xf32>
    %121 = vector.shape_cast %120 : vector<2x1x2x128xf32> to vector<2x2x128xf32>
    %122 = vector.broadcast %119 : vector<1x2x128xf32> to vector<2x2x128xf32>
    %123 = arith.mulf %122, %121 : vector<2x2x128xf32>
    %124 = arith.addf %115, %123 : vector<2x2x128xf32>
    %c12 = arith.constant 12 : index
    %c0_106 = arith.constant 0 : index
    %c0_107 = arith.constant 0 : index
    %c0_108 = arith.constant 0 : index
    %125 = vector.load %arg3[%c12, %c0_106, %c0_107, %c0_108] : memref<36x1x2x128xf32, #tpu.memory_space<vmem>>, vector<1x1x2x128xf32>
    %126 = vector.shape_cast %125 : vector<1x1x2x128xf32> to vector<1x2x128xf32>
    %127 = vector.shape_cast %126 : vector<1x2x128xf32> to vector<2x128xf32>
    %128 = vector.shape_cast %127 : vector<2x128xf32> to vector<1x2x128xf32>
    %c0_109 = arith.constant 0 : index
    %c5_110 = arith.constant 5 : index
    %c0_111 = arith.constant 0 : index
    %c0_112 = arith.constant 0 : index
    %129 = vector.load %arg5[%c0_109, %c5_110, %c0_111, %c0_112] : memref<2x8x2x128xf32, #tpu.memory_space<vmem>>, vector<2x1x2x128xf32>
    %130 = vector.shape_cast %129 : vector<2x1x2x128xf32> to vector<2x2x128xf32>
    %131 = vector.broadcast %128 : vector<1x2x128xf32> to vector<2x2x128xf32>
    %132 = arith.mulf %131, %130 : vector<2x2x128xf32>
    %133 = arith.addf %124, %132 : vector<2x2x128xf32>
    %c13 = arith.constant 13 : index
    %c0_113 = arith.constant 0 : index
    %c0_114 = arith.constant 0 : index
    %c0_115 = arith.constant 0 : index
    %134 = vector.load %arg3[%c13, %c0_113, %c0_114, %c0_115] : memref<36x1x2x128xf32, #tpu.memory_space<vmem>>, vector<1x1x2x128xf32>
    %135 = vector.shape_cast %134 : vector<1x1x2x128xf32> to vector<1x2x128xf32>
    %136 = vector.shape_cast %135 : vector<1x2x128xf32> to vector<2x128xf32>
    %137 = vector.shape_cast %136 : vector<2x128xf32> to vector<1x2x128xf32>
    %c0_116 = arith.constant 0 : index
    %c6_117 = arith.constant 6 : index
    %c0_118 = arith.constant 0 : index
    %c0_119 = arith.constant 0 : index
    %138 = vector.load %arg5[%c0_116, %c6_117, %c0_118, %c0_119] : memref<2x8x2x128xf32, #tpu.memory_space<vmem>>, vector<2x1x2x128xf32>
    %139 = vector.shape_cast %138 : vector<2x1x2x128xf32> to vector<2x2x128xf32>
    %140 = vector.broadcast %137 : vector<1x2x128xf32> to vector<2x2x128xf32>
    %141 = arith.mulf %140, %139 : vector<2x2x128xf32>
    %142 = arith.addf %133, %141 : vector<2x2x128xf32>
    %c14 = arith.constant 14 : index
    %c0_120 = arith.constant 0 : index
    %c0_121 = arith.constant 0 : index
    %c0_122 = arith.constant 0 : index
    %143 = vector.load %arg3[%c14, %c0_120, %c0_121, %c0_122] : memref<36x1x2x128xf32, #tpu.memory_space<vmem>>, vector<1x1x2x128xf32>
    %144 = vector.shape_cast %143 : vector<1x1x2x128xf32> to vector<1x2x128xf32>
    %145 = vector.shape_cast %144 : vector<1x2x128xf32> to vector<2x128xf32>
    %146 = vector.shape_cast %145 : vector<2x128xf32> to vector<1x2x128xf32>
    %c0_123 = arith.constant 0 : index
    %c7_124 = arith.constant 7 : index
    %c0_125 = arith.constant 0 : index
    %c0_126 = arith.constant 0 : index
    %147 = vector.load %arg5[%c0_123, %c7_124, %c0_125, %c0_126] : memref<2x8x2x128xf32, #tpu.memory_space<vmem>>, vector<2x1x2x128xf32>
    %148 = vector.shape_cast %147 : vector<2x1x2x128xf32> to vector<2x2x128xf32>
    %149 = vector.broadcast %146 : vector<1x2x128xf32> to vector<2x2x128xf32>
    %150 = arith.mulf %149, %148 : vector<2x2x128xf32>
    %151 = arith.addf %142, %150 : vector<2x2x128xf32>
    %152 = arith.mulf %87, %151 : vector<2x2x128xf32>
    %153 = arith.addf %85, %152 : vector<2x2x128xf32>
    %c0_127 = arith.constant 0 : index
    %c2_128 = arith.constant 2 : index
    %c0_129 = arith.constant 0 : index
    %c0_130 = arith.constant 0 : index
    %154 = vector.load %arg5[%c0_127, %c2_128, %c0_129, %c0_130] : memref<2x8x2x128xf32, #tpu.memory_space<vmem>>, vector<2x1x2x128xf32>
    %155 = vector.shape_cast %154 : vector<2x1x2x128xf32> to vector<2x2x128xf32>
    %cst_131 = arith.constant 0.000000e+00 : f32
    %156 = vector.broadcast %cst_131 : f32 to vector<2x2x128xf32>
    %c15 = arith.constant 15 : index
    %c0_132 = arith.constant 0 : index
    %c0_133 = arith.constant 0 : index
    %c0_134 = arith.constant 0 : index
    %157 = vector.load %arg3[%c15, %c0_132, %c0_133, %c0_134] : memref<36x1x2x128xf32, #tpu.memory_space<vmem>>, vector<1x1x2x128xf32>
    %158 = vector.shape_cast %157 : vector<1x1x2x128xf32> to vector<1x2x128xf32>
    %159 = vector.shape_cast %158 : vector<1x2x128xf32> to vector<2x128xf32>
    %160 = vector.shape_cast %159 : vector<2x128xf32> to vector<1x2x128xf32>
    %c0_135 = arith.constant 0 : index
    %c2_136 = arith.constant 2 : index
    %c0_137 = arith.constant 0 : index
    %c0_138 = arith.constant 0 : index
    %161 = vector.load %arg5[%c0_135, %c2_136, %c0_137, %c0_138] : memref<2x8x2x128xf32, #tpu.memory_space<vmem>>, vector<2x1x2x128xf32>
    %162 = vector.shape_cast %161 : vector<2x1x2x128xf32> to vector<2x2x128xf32>
    %163 = vector.broadcast %160 : vector<1x2x128xf32> to vector<2x2x128xf32>
    %164 = arith.mulf %163, %162 : vector<2x2x128xf32>
    %165 = arith.addf %156, %164 : vector<2x2x128xf32>
    %c16 = arith.constant 16 : index
    %c0_139 = arith.constant 0 : index
    %c0_140 = arith.constant 0 : index
    %c0_141 = arith.constant 0 : index
    %166 = vector.load %arg3[%c16, %c0_139, %c0_140, %c0_141] : memref<36x1x2x128xf32, #tpu.memory_space<vmem>>, vector<1x1x2x128xf32>
    %167 = vector.shape_cast %166 : vector<1x1x2x128xf32> to vector<1x2x128xf32>
    %168 = vector.shape_cast %167 : vector<1x2x128xf32> to vector<2x128xf32>
    %169 = vector.shape_cast %168 : vector<2x128xf32> to vector<1x2x128xf32>
    %c0_142 = arith.constant 0 : index
    %c3_143 = arith.constant 3 : index
    %c0_144 = arith.constant 0 : index
    %c0_145 = arith.constant 0 : index
    %170 = vector.load %arg5[%c0_142, %c3_143, %c0_144, %c0_145] : memref<2x8x2x128xf32, #tpu.memory_space<vmem>>, vector<2x1x2x128xf32>
    %171 = vector.shape_cast %170 : vector<2x1x2x128xf32> to vector<2x2x128xf32>
    %172 = vector.broadcast %169 : vector<1x2x128xf32> to vector<2x2x128xf32>
    %173 = arith.mulf %172, %171 : vector<2x2x128xf32>
    %174 = arith.addf %165, %173 : vector<2x2x128xf32>
    %c17 = arith.constant 17 : index
    %c0_146 = arith.constant 0 : index
    %c0_147 = arith.constant 0 : index
    %c0_148 = arith.constant 0 : index
    %175 = vector.load %arg3[%c17, %c0_146, %c0_147, %c0_148] : memref<36x1x2x128xf32, #tpu.memory_space<vmem>>, vector<1x1x2x128xf32>
    %176 = vector.shape_cast %175 : vector<1x1x2x128xf32> to vector<1x2x128xf32>
    %177 = vector.shape_cast %176 : vector<1x2x128xf32> to vector<2x128xf32>
    %178 = vector.shape_cast %177 : vector<2x128xf32> to vector<1x2x128xf32>
    %c0_149 = arith.constant 0 : index
    %c4_150 = arith.constant 4 : index
    %c0_151 = arith.constant 0 : index
    %c0_152 = arith.constant 0 : index
    %179 = vector.load %arg5[%c0_149, %c4_150, %c0_151, %c0_152] : memref<2x8x2x128xf32, #tpu.memory_space<vmem>>, vector<2x1x2x128xf32>
    %180 = vector.shape_cast %179 : vector<2x1x2x128xf32> to vector<2x2x128xf32>
    %181 = vector.broadcast %178 : vector<1x2x128xf32> to vector<2x2x128xf32>
    %182 = arith.mulf %181, %180 : vector<2x2x128xf32>
    %183 = arith.addf %174, %182 : vector<2x2x128xf32>
    %c18 = arith.constant 18 : index
    %c0_153 = arith.constant 0 : index
    %c0_154 = arith.constant 0 : index
    %c0_155 = arith.constant 0 : index
    %184 = vector.load %arg3[%c18, %c0_153, %c0_154, %c0_155] : memref<36x1x2x128xf32, #tpu.memory_space<vmem>>, vector<1x1x2x128xf32>
    %185 = vector.shape_cast %184 : vector<1x1x2x128xf32> to vector<1x2x128xf32>
    %186 = vector.shape_cast %185 : vector<1x2x128xf32> to vector<2x128xf32>
    %187 = vector.shape_cast %186 : vector<2x128xf32> to vector<1x2x128xf32>
    %c0_156 = arith.constant 0 : index
    %c5_157 = arith.constant 5 : index
    %c0_158 = arith.constant 0 : index
    %c0_159 = arith.constant 0 : index
    %188 = vector.load %arg5[%c0_156, %c5_157, %c0_158, %c0_159] : memref<2x8x2x128xf32, #tpu.memory_space<vmem>>, vector<2x1x2x128xf32>
    %189 = vector.shape_cast %188 : vector<2x1x2x128xf32> to vector<2x2x128xf32>
    %190 = vector.broadcast %187 : vector<1x2x128xf32> to vector<2x2x128xf32>
    %191 = arith.mulf %190, %189 : vector<2x2x128xf32>
    %192 = arith.addf %183, %191 : vector<2x2x128xf32>
    %c19 = arith.constant 19 : index
    %c0_160 = arith.constant 0 : index
    %c0_161 = arith.constant 0 : index
    %c0_162 = arith.constant 0 : index
    %193 = vector.load %arg3[%c19, %c0_160, %c0_161, %c0_162] : memref<36x1x2x128xf32, #tpu.memory_space<vmem>>, vector<1x1x2x128xf32>
    %194 = vector.shape_cast %193 : vector<1x1x2x128xf32> to vector<1x2x128xf32>
    %195 = vector.shape_cast %194 : vector<1x2x128xf32> to vector<2x128xf32>
    %196 = vector.shape_cast %195 : vector<2x128xf32> to vector<1x2x128xf32>
    %c0_163 = arith.constant 0 : index
    %c6_164 = arith.constant 6 : index
    %c0_165 = arith.constant 0 : index
    %c0_166 = arith.constant 0 : index
    %197 = vector.load %arg5[%c0_163, %c6_164, %c0_165, %c0_166] : memref<2x8x2x128xf32, #tpu.memory_space<vmem>>, vector<2x1x2x128xf32>
    %198 = vector.shape_cast %197 : vector<2x1x2x128xf32> to vector<2x2x128xf32>
    %199 = vector.broadcast %196 : vector<1x2x128xf32> to vector<2x2x128xf32>
    %200 = arith.mulf %199, %198 : vector<2x2x128xf32>
    %201 = arith.addf %192, %200 : vector<2x2x128xf32>
    %c20 = arith.constant 20 : index
    %c0_167 = arith.constant 0 : index
    %c0_168 = arith.constant 0 : index
    %c0_169 = arith.constant 0 : index
    %202 = vector.load %arg3[%c20, %c0_167, %c0_168, %c0_169] : memref<36x1x2x128xf32, #tpu.memory_space<vmem>>, vector<1x1x2x128xf32>
    %203 = vector.shape_cast %202 : vector<1x1x2x128xf32> to vector<1x2x128xf32>
    %204 = vector.shape_cast %203 : vector<1x2x128xf32> to vector<2x128xf32>
    %205 = vector.shape_cast %204 : vector<2x128xf32> to vector<1x2x128xf32>
    %c0_170 = arith.constant 0 : index
    %c7_171 = arith.constant 7 : index
    %c0_172 = arith.constant 0 : index
    %c0_173 = arith.constant 0 : index
    %206 = vector.load %arg5[%c0_170, %c7_171, %c0_172, %c0_173] : memref<2x8x2x128xf32, #tpu.memory_space<vmem>>, vector<2x1x2x128xf32>
    %207 = vector.shape_cast %206 : vector<2x1x2x128xf32> to vector<2x2x128xf32>
    %208 = vector.broadcast %205 : vector<1x2x128xf32> to vector<2x2x128xf32>
    %209 = arith.mulf %208, %207 : vector<2x2x128xf32>
    %210 = arith.addf %201, %209 : vector<2x2x128xf32>
    %211 = arith.mulf %155, %210 : vector<2x2x128xf32>
    %212 = arith.addf %153, %211 : vector<2x2x128xf32>
    %c0_174 = arith.constant 0 : index
    %c3_175 = arith.constant 3 : index
    %c0_176 = arith.constant 0 : index
    %c0_177 = arith.constant 0 : index
    %213 = vector.load %arg5[%c0_174, %c3_175, %c0_176, %c0_177] : memref<2x8x2x128xf32, #tpu.memory_space<vmem>>, vector<2x1x2x128xf32>
    %214 = vector.shape_cast %213 : vector<2x1x2x128xf32> to vector<2x2x128xf32>
    %cst_178 = arith.constant 0.000000e+00 : f32
    %215 = vector.broadcast %cst_178 : f32 to vector<2x2x128xf32>
    %c21 = arith.constant 21 : index
    %c0_179 = arith.constant 0 : index
    %c0_180 = arith.constant 0 : index
    %c0_181 = arith.constant 0 : index
    %216 = vector.load %arg3[%c21, %c0_179, %c0_180, %c0_181] : memref<36x1x2x128xf32, #tpu.memory_space<vmem>>, vector<1x1x2x128xf32>
    %217 = vector.shape_cast %216 : vector<1x1x2x128xf32> to vector<1x2x128xf32>
    %218 = vector.shape_cast %217 : vector<1x2x128xf32> to vector<2x128xf32>
    %219 = vector.shape_cast %218 : vector<2x128xf32> to vector<1x2x128xf32>
    %c0_182 = arith.constant 0 : index
    %c3_183 = arith.constant 3 : index
    %c0_184 = arith.constant 0 : index
    %c0_185 = arith.constant 0 : index
    %220 = vector.load %arg5[%c0_182, %c3_183, %c0_184, %c0_185] : memref<2x8x2x128xf32, #tpu.memory_space<vmem>>, vector<2x1x2x128xf32>
    %221 = vector.shape_cast %220 : vector<2x1x2x128xf32> to vector<2x2x128xf32>
    %222 = vector.broadcast %219 : vector<1x2x128xf32> to vector<2x2x128xf32>
    %223 = arith.mulf %222, %221 : vector<2x2x128xf32>
    %224 = arith.addf %215, %223 : vector<2x2x128xf32>
    %c22 = arith.constant 22 : index
    %c0_186 = arith.constant 0 : index
    %c0_187 = arith.constant 0 : index
    %c0_188 = arith.constant 0 : index
    %225 = vector.load %arg3[%c22, %c0_186, %c0_187, %c0_188] : memref<36x1x2x128xf32, #tpu.memory_space<vmem>>, vector<1x1x2x128xf32>
    %226 = vector.shape_cast %225 : vector<1x1x2x128xf32> to vector<1x2x128xf32>
    %227 = vector.shape_cast %226 : vector<1x2x128xf32> to vector<2x128xf32>
    %228 = vector.shape_cast %227 : vector<2x128xf32> to vector<1x2x128xf32>
    %c0_189 = arith.constant 0 : index
    %c4_190 = arith.constant 4 : index
    %c0_191 = arith.constant 0 : index
    %c0_192 = arith.constant 0 : index
    %229 = vector.load %arg5[%c0_189, %c4_190, %c0_191, %c0_192] : memref<2x8x2x128xf32, #tpu.memory_space<vmem>>, vector<2x1x2x128xf32>
    %230 = vector.shape_cast %229 : vector<2x1x2x128xf32> to vector<2x2x128xf32>
    %231 = vector.broadcast %228 : vector<1x2x128xf32> to vector<2x2x128xf32>
    %232 = arith.mulf %231, %230 : vector<2x2x128xf32>
    %233 = arith.addf %224, %232 : vector<2x2x128xf32>
    %c23 = arith.constant 23 : index
    %c0_193 = arith.constant 0 : index
    %c0_194 = arith.constant 0 : index
    %c0_195 = arith.constant 0 : index
    %234 = vector.load %arg3[%c23, %c0_193, %c0_194, %c0_195] : memref<36x1x2x128xf32, #tpu.memory_space<vmem>>, vector<1x1x2x128xf32>
    %235 = vector.shape_cast %234 : vector<1x1x2x128xf32> to vector<1x2x128xf32>
    %236 = vector.shape_cast %235 : vector<1x2x128xf32> to vector<2x128xf32>
    %237 = vector.shape_cast %236 : vector<2x128xf32> to vector<1x2x128xf32>
    %c0_196 = arith.constant 0 : index
    %c5_197 = arith.constant 5 : index
    %c0_198 = arith.constant 0 : index
    %c0_199 = arith.constant 0 : index
    %238 = vector.load %arg5[%c0_196, %c5_197, %c0_198, %c0_199] : memref<2x8x2x128xf32, #tpu.memory_space<vmem>>, vector<2x1x2x128xf32>
    %239 = vector.shape_cast %238 : vector<2x1x2x128xf32> to vector<2x2x128xf32>
    %240 = vector.broadcast %237 : vector<1x2x128xf32> to vector<2x2x128xf32>
    %241 = arith.mulf %240, %239 : vector<2x2x128xf32>
    %242 = arith.addf %233, %241 : vector<2x2x128xf32>
    %c24 = arith.constant 24 : index
    %c0_200 = arith.constant 0 : index
    %c0_201 = arith.constant 0 : index
    %c0_202 = arith.constant 0 : index
    %243 = vector.load %arg3[%c24, %c0_200, %c0_201, %c0_202] : memref<36x1x2x128xf32, #tpu.memory_space<vmem>>, vector<1x1x2x128xf32>
    %244 = vector.shape_cast %243 : vector<1x1x2x128xf32> to vector<1x2x128xf32>
    %245 = vector.shape_cast %244 : vector<1x2x128xf32> to vector<2x128xf32>
    %246 = vector.shape_cast %245 : vector<2x128xf32> to vector<1x2x128xf32>
    %c0_203 = arith.constant 0 : index
    %c6_204 = arith.constant 6 : index
    %c0_205 = arith.constant 0 : index
    %c0_206 = arith.constant 0 : index
    %247 = vector.load %arg5[%c0_203, %c6_204, %c0_205, %c0_206] : memref<2x8x2x128xf32, #tpu.memory_space<vmem>>, vector<2x1x2x128xf32>
    %248 = vector.shape_cast %247 : vector<2x1x2x128xf32> to vector<2x2x128xf32>
    %249 = vector.broadcast %246 : vector<1x2x128xf32> to vector<2x2x128xf32>
    %250 = arith.mulf %249, %248 : vector<2x2x128xf32>
    %251 = arith.addf %242, %250 : vector<2x2x128xf32>
    %c25 = arith.constant 25 : index
    %c0_207 = arith.constant 0 : index
    %c0_208 = arith.constant 0 : index
    %c0_209 = arith.constant 0 : index
    %252 = vector.load %arg3[%c25, %c0_207, %c0_208, %c0_209] : memref<36x1x2x128xf32, #tpu.memory_space<vmem>>, vector<1x1x2x128xf32>
    %253 = vector.shape_cast %252 : vector<1x1x2x128xf32> to vector<1x2x128xf32>
    %254 = vector.shape_cast %253 : vector<1x2x128xf32> to vector<2x128xf32>
    %255 = vector.shape_cast %254 : vector<2x128xf32> to vector<1x2x128xf32>
    %c0_210 = arith.constant 0 : index
    %c7_211 = arith.constant 7 : index
    %c0_212 = arith.constant 0 : index
    %c0_213 = arith.constant 0 : index
    %256 = vector.load %arg5[%c0_210, %c7_211, %c0_212, %c0_213] : memref<2x8x2x128xf32, #tpu.memory_space<vmem>>, vector<2x1x2x128xf32>
    %257 = vector.shape_cast %256 : vector<2x1x2x128xf32> to vector<2x2x128xf32>
    %258 = vector.broadcast %255 : vector<1x2x128xf32> to vector<2x2x128xf32>
    %259 = arith.mulf %258, %257 : vector<2x2x128xf32>
    %260 = arith.addf %251, %259 : vector<2x2x128xf32>
    %261 = arith.mulf %214, %260 : vector<2x2x128xf32>
    %262 = arith.addf %212, %261 : vector<2x2x128xf32>
    %c0_214 = arith.constant 0 : index
    %c4_215 = arith.constant 4 : index
    %c0_216 = arith.constant 0 : index
    %c0_217 = arith.constant 0 : index
    %263 = vector.load %arg5[%c0_214, %c4_215, %c0_216, %c0_217] : memref<2x8x2x128xf32, #tpu.memory_space<vmem>>, vector<2x1x2x128xf32>
    %264 = vector.shape_cast %263 : vector<2x1x2x128xf32> to vector<2x2x128xf32>
    %cst_218 = arith.constant 0.000000e+00 : f32
    %265 = vector.broadcast %cst_218 : f32 to vector<2x2x128xf32>
    %c26 = arith.constant 26 : index
    %c0_219 = arith.constant 0 : index
    %c0_220 = arith.constant 0 : index
    %c0_221 = arith.constant 0 : index
    %266 = vector.load %arg3[%c26, %c0_219, %c0_220, %c0_221] : memref<36x1x2x128xf32, #tpu.memory_space<vmem>>, vector<1x1x2x128xf32>
    %267 = vector.shape_cast %266 : vector<1x1x2x128xf32> to vector<1x2x128xf32>
    %268 = vector.shape_cast %267 : vector<1x2x128xf32> to vector<2x128xf32>
    %269 = vector.shape_cast %268 : vector<2x128xf32> to vector<1x2x128xf32>
    %c0_222 = arith.constant 0 : index
    %c4_223 = arith.constant 4 : index
    %c0_224 = arith.constant 0 : index
    %c0_225 = arith.constant 0 : index
    %270 = vector.load %arg5[%c0_222, %c4_223, %c0_224, %c0_225] : memref<2x8x2x128xf32, #tpu.memory_space<vmem>>, vector<2x1x2x128xf32>
    %271 = vector.shape_cast %270 : vector<2x1x2x128xf32> to vector<2x2x128xf32>
    %272 = vector.broadcast %269 : vector<1x2x128xf32> to vector<2x2x128xf32>
    %273 = arith.mulf %272, %271 : vector<2x2x128xf32>
    %274 = arith.addf %265, %273 : vector<2x2x128xf32>
    %c27 = arith.constant 27 : index
    %c0_226 = arith.constant 0 : index
    %c0_227 = arith.constant 0 : index
    %c0_228 = arith.constant 0 : index
    %275 = vector.load %arg3[%c27, %c0_226, %c0_227, %c0_228] : memref<36x1x2x128xf32, #tpu.memory_space<vmem>>, vector<1x1x2x128xf32>
    %276 = vector.shape_cast %275 : vector<1x1x2x128xf32> to vector<1x2x128xf32>
    %277 = vector.shape_cast %276 : vector<1x2x128xf32> to vector<2x128xf32>
    %278 = vector.shape_cast %277 : vector<2x128xf32> to vector<1x2x128xf32>
    %c0_229 = arith.constant 0 : index
    %c5_230 = arith.constant 5 : index
    %c0_231 = arith.constant 0 : index
    %c0_232 = arith.constant 0 : index
    %279 = vector.load %arg5[%c0_229, %c5_230, %c0_231, %c0_232] : memref<2x8x2x128xf32, #tpu.memory_space<vmem>>, vector<2x1x2x128xf32>
    %280 = vector.shape_cast %279 : vector<2x1x2x128xf32> to vector<2x2x128xf32>
    %281 = vector.broadcast %278 : vector<1x2x128xf32> to vector<2x2x128xf32>
    %282 = arith.mulf %281, %280 : vector<2x2x128xf32>
    %283 = arith.addf %274, %282 : vector<2x2x128xf32>
    %c28 = arith.constant 28 : index
    %c0_233 = arith.constant 0 : index
    %c0_234 = arith.constant 0 : index
    %c0_235 = arith.constant 0 : index
    %284 = vector.load %arg3[%c28, %c0_233, %c0_234, %c0_235] : memref<36x1x2x128xf32, #tpu.memory_space<vmem>>, vector<1x1x2x128xf32>
    %285 = vector.shape_cast %284 : vector<1x1x2x128xf32> to vector<1x2x128xf32>
    %286 = vector.shape_cast %285 : vector<1x2x128xf32> to vector<2x128xf32>
    %287 = vector.shape_cast %286 : vector<2x128xf32> to vector<1x2x128xf32>
    %c0_236 = arith.constant 0 : index
    %c6_237 = arith.constant 6 : index
    %c0_238 = arith.constant 0 : index
    %c0_239 = arith.constant 0 : index
    %288 = vector.load %arg5[%c0_236, %c6_237, %c0_238, %c0_239] : memref<2x8x2x128xf32, #tpu.memory_space<vmem>>, vector<2x1x2x128xf32>
    %289 = vector.shape_cast %288 : vector<2x1x2x128xf32> to vector<2x2x128xf32>
    %290 = vector.broadcast %287 : vector<1x2x128xf32> to vector<2x2x128xf32>
    %291 = arith.mulf %290, %289 : vector<2x2x128xf32>
    %292 = arith.addf %283, %291 : vector<2x2x128xf32>
    %c29 = arith.constant 29 : index
    %c0_240 = arith.constant 0 : index
    %c0_241 = arith.constant 0 : index
    %c0_242 = arith.constant 0 : index
    %293 = vector.load %arg3[%c29, %c0_240, %c0_241, %c0_242] : memref<36x1x2x128xf32, #tpu.memory_space<vmem>>, vector<1x1x2x128xf32>
    %294 = vector.shape_cast %293 : vector<1x1x2x128xf32> to vector<1x2x128xf32>
    %295 = vector.shape_cast %294 : vector<1x2x128xf32> to vector<2x128xf32>
    %296 = vector.shape_cast %295 : vector<2x128xf32> to vector<1x2x128xf32>
    %c0_243 = arith.constant 0 : index
    %c7_244 = arith.constant 7 : index
    %c0_245 = arith.constant 0 : index
    %c0_246 = arith.constant 0 : index
    %297 = vector.load %arg5[%c0_243, %c7_244, %c0_245, %c0_246] : memref<2x8x2x128xf32, #tpu.memory_space<vmem>>, vector<2x1x2x128xf32>
    %298 = vector.shape_cast %297 : vector<2x1x2x128xf32> to vector<2x2x128xf32>
    %299 = vector.broadcast %296 : vector<1x2x128xf32> to vector<2x2x128xf32>
    %300 = arith.mulf %299, %298 : vector<2x2x128xf32>
    %301 = arith.addf %292, %300 : vector<2x2x128xf32>
    %302 = arith.mulf %264, %301 : vector<2x2x128xf32>
    %303 = arith.addf %262, %302 : vector<2x2x128xf32>
    %c0_247 = arith.constant 0 : index
    %c5_248 = arith.constant 5 : index
    %c0_249 = arith.constant 0 : index
    %c0_250 = arith.constant 0 : index
    %304 = vector.load %arg5[%c0_247, %c5_248, %c0_249, %c0_250] : memref<2x8x2x128xf32, #tpu.memory_space<vmem>>, vector<2x1x2x128xf32>
    %305 = vector.shape_cast %304 : vector<2x1x2x128xf32> to vector<2x2x128xf32>
    %cst_251 = arith.constant 0.000000e+00 : f32
    %306 = vector.broadcast %cst_251 : f32 to vector<2x2x128xf32>
    %c30 = arith.constant 30 : index
    %c0_252 = arith.constant 0 : index
    %c0_253 = arith.constant 0 : index
    %c0_254 = arith.constant 0 : index
    %307 = vector.load %arg3[%c30, %c0_252, %c0_253, %c0_254] : memref<36x1x2x128xf32, #tpu.memory_space<vmem>>, vector<1x1x2x128xf32>
    %308 = vector.shape_cast %307 : vector<1x1x2x128xf32> to vector<1x2x128xf32>
    %309 = vector.shape_cast %308 : vector<1x2x128xf32> to vector<2x128xf32>
    %310 = vector.shape_cast %309 : vector<2x128xf32> to vector<1x2x128xf32>
    %c0_255 = arith.constant 0 : index
    %c5_256 = arith.constant 5 : index
    %c0_257 = arith.constant 0 : index
    %c0_258 = arith.constant 0 : index
    %311 = vector.load %arg5[%c0_255, %c5_256, %c0_257, %c0_258] : memref<2x8x2x128xf32, #tpu.memory_space<vmem>>, vector<2x1x2x128xf32>
    %312 = vector.shape_cast %311 : vector<2x1x2x128xf32> to vector<2x2x128xf32>
    %313 = vector.broadcast %310 : vector<1x2x128xf32> to vector<2x2x128xf32>
    %314 = arith.mulf %313, %312 : vector<2x2x128xf32>
    %315 = arith.addf %306, %314 : vector<2x2x128xf32>
    %c31 = arith.constant 31 : index
    %c0_259 = arith.constant 0 : index
    %c0_260 = arith.constant 0 : index
    %c0_261 = arith.constant 0 : index
    %316 = vector.load %arg3[%c31, %c0_259, %c0_260, %c0_261] : memref<36x1x2x128xf32, #tpu.memory_space<vmem>>, vector<1x1x2x128xf32>
    %317 = vector.shape_cast %316 : vector<1x1x2x128xf32> to vector<1x2x128xf32>
    %318 = vector.shape_cast %317 : vector<1x2x128xf32> to vector<2x128xf32>
    %319 = vector.shape_cast %318 : vector<2x128xf32> to vector<1x2x128xf32>
    %c0_262 = arith.constant 0 : index
    %c6_263 = arith.constant 6 : index
    %c0_264 = arith.constant 0 : index
    %c0_265 = arith.constant 0 : index
    %320 = vector.load %arg5[%c0_262, %c6_263, %c0_264, %c0_265] : memref<2x8x2x128xf32, #tpu.memory_space<vmem>>, vector<2x1x2x128xf32>
    %321 = vector.shape_cast %320 : vector<2x1x2x128xf32> to vector<2x2x128xf32>
    %322 = vector.broadcast %319 : vector<1x2x128xf32> to vector<2x2x128xf32>
    %323 = arith.mulf %322, %321 : vector<2x2x128xf32>
    %324 = arith.addf %315, %323 : vector<2x2x128xf32>
    %c32 = arith.constant 32 : index
    %c0_266 = arith.constant 0 : index
    %c0_267 = arith.constant 0 : index
    %c0_268 = arith.constant 0 : index
    %325 = vector.load %arg3[%c32, %c0_266, %c0_267, %c0_268] : memref<36x1x2x128xf32, #tpu.memory_space<vmem>>, vector<1x1x2x128xf32>
    %326 = vector.shape_cast %325 : vector<1x1x2x128xf32> to vector<1x2x128xf32>
    %327 = vector.shape_cast %326 : vector<1x2x128xf32> to vector<2x128xf32>
    %328 = vector.shape_cast %327 : vector<2x128xf32> to vector<1x2x128xf32>
    %c0_269 = arith.constant 0 : index
    %c7_270 = arith.constant 7 : index
    %c0_271 = arith.constant 0 : index
    %c0_272 = arith.constant 0 : index
    %329 = vector.load %arg5[%c0_269, %c7_270, %c0_271, %c0_272] : memref<2x8x2x128xf32, #tpu.memory_space<vmem>>, vector<2x1x2x128xf32>
    %330 = vector.shape_cast %329 : vector<2x1x2x128xf32> to vector<2x2x128xf32>
    %331 = vector.broadcast %328 : vector<1x2x128xf32> to vector<2x2x128xf32>
    %332 = arith.mulf %331, %330 : vector<2x2x128xf32>
    %333 = arith.addf %324, %332 : vector<2x2x128xf32>
    %334 = arith.mulf %305, %333 : vector<2x2x128xf32>
    %335 = arith.addf %303, %334 : vector<2x2x128xf32>
    %c0_273 = arith.constant 0 : index
    %c6_274 = arith.constant 6 : index
    %c0_275 = arith.constant 0 : index
    %c0_276 = arith.constant 0 : index
    %336 = vector.load %arg5[%c0_273, %c6_274, %c0_275, %c0_276] : memref<2x8x2x128xf32, #tpu.memory_space<vmem>>, vector<2x1x2x128xf32>
    %337 = vector.shape_cast %336 : vector<2x1x2x128xf32> to vector<2x2x128xf32>
    %cst_277 = arith.constant 0.000000e+00 : f32
    %338 = vector.broadcast %cst_277 : f32 to vector<2x2x128xf32>
    %c33 = arith.constant 33 : index
    %c0_278 = arith.constant 0 : index
    %c0_279 = arith.constant 0 : index
    %c0_280 = arith.constant 0 : index
    %339 = vector.load %arg3[%c33, %c0_278, %c0_279, %c0_280] : memref<36x1x2x128xf32, #tpu.memory_space<vmem>>, vector<1x1x2x128xf32>
    %340 = vector.shape_cast %339 : vector<1x1x2x128xf32> to vector<1x2x128xf32>
    %341 = vector.shape_cast %340 : vector<1x2x128xf32> to vector<2x128xf32>
    %342 = vector.shape_cast %341 : vector<2x128xf32> to vector<1x2x128xf32>
    %c0_281 = arith.constant 0 : index
    %c6_282 = arith.constant 6 : index
    %c0_283 = arith.constant 0 : index
    %c0_284 = arith.constant 0 : index
    %343 = vector.load %arg5[%c0_281, %c6_282, %c0_283, %c0_284] : memref<2x8x2x128xf32, #tpu.memory_space<vmem>>, vector<2x1x2x128xf32>
    %344 = vector.shape_cast %343 : vector<2x1x2x128xf32> to vector<2x2x128xf32>
    %345 = vector.broadcast %342 : vector<1x2x128xf32> to vector<2x2x128xf32>
    %346 = arith.mulf %345, %344 : vector<2x2x128xf32>
    %347 = arith.addf %338, %346 : vector<2x2x128xf32>
    %c34 = arith.constant 34 : index
    %c0_285 = arith.constant 0 : index
    %c0_286 = arith.constant 0 : index
    %c0_287 = arith.constant 0 : index
    %348 = vector.load %arg3[%c34, %c0_285, %c0_286, %c0_287] : memref<36x1x2x128xf32, #tpu.memory_space<vmem>>, vector<1x1x2x128xf32>
    %349 = vector.shape_cast %348 : vector<1x1x2x128xf32> to vector<1x2x128xf32>
    %350 = vector.shape_cast %349 : vector<1x2x128xf32> to vector<2x128xf32>
    %351 = vector.shape_cast %350 : vector<2x128xf32> to vector<1x2x128xf32>
    %c0_288 = arith.constant 0 : index
    %c7_289 = arith.constant 7 : index
    %c0_290 = arith.constant 0 : index
    %c0_291 = arith.constant 0 : index
    %352 = vector.load %arg5[%c0_288, %c7_289, %c0_290, %c0_291] : memref<2x8x2x128xf32, #tpu.memory_space<vmem>>, vector<2x1x2x128xf32>
    %353 = vector.shape_cast %352 : vector<2x1x2x128xf32> to vector<2x2x128xf32>
    %354 = vector.broadcast %351 : vector<1x2x128xf32> to vector<2x2x128xf32>
    %355 = arith.mulf %354, %353 : vector<2x2x128xf32>
    %356 = arith.addf %347, %355 : vector<2x2x128xf32>
    %357 = arith.mulf %337, %356 : vector<2x2x128xf32>
    %358 = arith.addf %335, %357 : vector<2x2x128xf32>
    %c0_292 = arith.constant 0 : index
    %c7_293 = arith.constant 7 : index
    %c0_294 = arith.constant 0 : index
    %c0_295 = arith.constant 0 : index
    %359 = vector.load %arg5[%c0_292, %c7_293, %c0_294, %c0_295] : memref<2x8x2x128xf32, #tpu.memory_space<vmem>>, vector<2x1x2x128xf32>
    %360 = vector.shape_cast %359 : vector<2x1x2x128xf32> to vector<2x2x128xf32>
    %cst_296 = arith.constant 0.000000e+00 : f32
    %361 = vector.broadcast %cst_296 : f32 to vector<2x2x128xf32>
    %c35 = arith.constant 35 : index
    %c0_297 = arith.constant 0 : index
    %c0_298 = arith.constant 0 : index
    %c0_299 = arith.constant 0 : index
    %362 = vector.load %arg3[%c35, %c0_297, %c0_298, %c0_299] : memref<36x1x2x128xf32, #tpu.memory_space<vmem>>, vector<1x1x2x128xf32>
    %363 = vector.shape_cast %362 : vector<1x1x2x128xf32> to vector<1x2x128xf32>
    %364 = vector.shape_cast %363 : vector<1x2x128xf32> to vector<2x128xf32>
    %365 = vector.shape_cast %364 : vector<2x128xf32> to vector<1x2x128xf32>
    %c0_300 = arith.constant 0 : index
    %c7_301 = arith.constant 7 : index
    %c0_302 = arith.constant 0 : index
    %c0_303 = arith.constant 0 : index
    %366 = vector.load %arg5[%c0_300, %c7_301, %c0_302, %c0_303] : memref<2x8x2x128xf32, #tpu.memory_space<vmem>>, vector<2x1x2x128xf32>
    %367 = vector.shape_cast %366 : vector<2x1x2x128xf32> to vector<2x2x128xf32>
    %368 = vector.broadcast %365 : vector<1x2x128xf32> to vector<2x2x128xf32>
    %369 = arith.mulf %368, %367 : vector<2x2x128xf32>
    %370 = arith.addf %361, %369 : vector<2x2x128xf32>
    %371 = arith.mulf %360, %370 : vector<2x2x128xf32>
    %372 = arith.addf %358, %371 : vector<2x2x128xf32>
    %cst_304 = arith.constant 0.000000e+00 : f32
    %373 = vector.broadcast %cst_304 : f32 to vector<2x2x128xf32>
    %374 = arith.maximumf %372, %373 : vector<2x2x128xf32>
    %375 = math.sqrt %374 : vector<2x2x128xf32>
    %376 = vector.shape_cast %375 : vector<2x2x128xf32> to vector<2x1x2x128xf32>
    %c0_305 = arith.constant 0 : index
    %c0_306 = arith.constant 0 : index
    %c0_307 = arith.constant 0 : index
    %c0_308 = arith.constant 0 : index
    %377 = vector.load %arg4[%c0_305, %c0_306, %c0_307, %c0_308] : memref<2x1x2x128xf32, #tpu.memory_space<vmem>>, vector<2x1x2x128xf32>
    tpu.vector_store %arg4[%c0_305, %c0_306, %c0_307, %c0_308], %376 {strides = array<i32>} : memref<2x1x2x128xf32, #tpu.memory_space<vmem>>, vector<2x1x2x128xf32>,
    return
  }
  func.func @transform_0(%arg0: i32) -> (i32, i32, i32, i32) {
    %c0_i32 = arith.constant 0 : i32
    %c0_i32_0 = arith.constant 0 : i32
    %c0_i32_1 = arith.constant 0 : i32
    %c0_i32_2 = arith.constant 0 : i32
    return %c0_i32, %arg0, %c0_i32_0, %c0_i32_1 : i32, i32, i32, i32
  }
  func.func @transform_1(%arg0: i32) -> (i32, i32, i32, i32) {
    %c0_i32 = arith.constant 0 : i32
    %c0_i32_0 = arith.constant 0 : i32
    %c0_i32_1 = arith.constant 0 : i32
    %c0_i32_2 = arith.constant 0 : i32
    return %c0_i32, %arg0, %c0_i32_0, %c0_i32_1 : i32, i32, i32, i32
  }
  func.func @transform_2(%arg0: i32) -> (i32, i32, i32, i32) {
    %c0_i32 = arith.constant 0 : i32
    %c0_i32_0 = arith.constant 0 : i32
    %c0_i32_1 = arith.constant 0 : i32
    %c0_i32_2 = arith.constant 0 : i32
    return %c0_i32, %arg0, %c0_i32_0, %c0_i32_1 : i32, i32, i32, i32
  }
  func.func @transform_3(%arg0: i32) -> (i32, i32, i32, i32) {
    %c0_i32 = arith.constant 0 : i32
    %c0_i32_0 = arith.constant 0 : i32
    %c0_i32_1 = arith.constant 0 : i32
    %c0_i32_2 = arith.constant 0 : i32
    return %c0_i32, %arg0, %c0_i32_0, %c0_i32_1 : i32, i32, i32, i32
  }
}

</mosaic_0001>

<bundles_post_ra>
// kernel: tpu_custom_call.1
= control target key start
LH: loop header
LB: loop body
LE: loop exit
PB: predicated region body
PF: predicated region fallthrough
CT: control target
= control target key end

     0   :  { %8 = vsyncpa [#allocation4], 0  ;;  %s826_s0 = inlined_call_operand.hbm [shape: f32[16,1,2,128], index: 0, kind: input, shape index: {}]   ;;  %s827_s1 = inlined_call_operand.hbm [shape: f32[8,1,2,128], index: 1, kind: input, shape index: {}]   ;;  %s828_s2 = inlined_call_operand.hbm [shape: f32[36,1,2,128], index: 2, kind: input, shape index: {}]   ;;  %s829_s3 = inlined_call_operand.hbm [shape: f32[2,1,2,128], index: 3, kind: output, shape index: {}]  }
   0x1   :  { %9 = vsyncpa [#allocation7], 0 }
   0x2   :  { %10 = vsyncpa [#allocation5], 0  ;;  %s514_s12 = smov [#allocation6]   ;;  %s515_s14 = smov [#allocation3]  }
   0x3   :  { %s28_s13 = sshll.u32 %s514_s12, 4  ;;  %s16_s15 = sshll.u32 %s515_s14, 4  ;;  %s29_s13 = int_to_ptr.vmem [resolvable:$true] %s28_s13  ;;  %s17_s15 = int_to_ptr.vmem [resolvable:$true] %s16_s15 }
   0x4   :  { %s436_s16 = scalar_lea.vmem %s29_s13, 256  ;;  %p441_p1 = scmp.lt.s32.totalorder %s29_s13, %s29_s13 }
   0x5   :  { %p437_p0 = scmp.ne.s32.totalorder %s29_s13, %s436_s16  ;;  %p442_p2 = scmp.lt.s32.totalorder %s436_s16, %s436_s16 }
   0x7   :  { %p443_p3 = por %p442_p2, %p441_p1 }
   0x9   :  { %p444_p4 = pnand %p443_p3, %p437_p0 }
   0xb   :  { %447 = shalt.err (!%p444_p4)
}
   0xc   :  { %s516_s17 = smov 32   ;;  %s517_s18 = smov 2  }
   0xd   :  { %34 = dma.hbm_to_vmem [thread:$0]  %s827_s1, 256, %s29_s13, [#allocation7], %s516_s17, %s516_s17, %s517_s18  }
   0xe   :  { %s456_s21 = scalar_lea.vmem %s17_s15, 512  ;;  %p461_p6 = scmp.lt.s32.totalorder %s17_s15, %s17_s15 }
   0xf   :  { %p457_p5 = scmp.ne.s32.totalorder %s17_s15, %s456_s21  ;;  %p462_p7 = scmp.lt.s32.totalorder %s456_s21, %s456_s21 }
  0x11   :  { %p463_p8 = por %p462_p7, %p461_p6 }
  0x13   :  { %p464_p9 = pnand %p463_p8, %p457_p5 }
  0x15   :  { %467 = shalt.err (!%p464_p9)
}
  0x16   :  { %22 = dma.hbm_to_vmem [thread:$0]  %s826_s0, 512, %s17_s15, [#allocation4], %s516_s17, %s516_s17, %s517_s18  }
  0x17   :  { %s518_s24 = smov [#allocation8]  }
  0x18   :  { %s40_s25 = sshll.u32 %s518_s24, 4  ;;  %s41_s25 = int_to_ptr.vmem [resolvable:$true] %s40_s25 }
  0x19   :  { %s476_s26 = scalar_lea.vmem %s41_s25, 1152  ;;  %p481_p11 = scmp.lt.s32.totalorder %s41_s25, %s41_s25 }
  0x1a   :  { %p477_p10 = scmp.ne.s32.totalorder %s41_s25, %s476_s26  ;;  %p482_p12 = scmp.lt.s32.totalorder %s476_s26, %s476_s26 }
  0x1c   :  { %p483_p13 = por %p482_p12, %p481_p11 }
  0x1e   :  { %p484_p0 = pnand %p483_p13, %p477_p10 }
  0x20   :  { %487 = shalt.err (!%p484_p0)
}
  0x21   :  { %46 = dma.hbm_to_vmem [thread:$0]  %s828_s2, 1152, %s41_s25, [#allocation7], %s516_s17, %s516_s17, %s517_s18  }
  0x22   :  { %508 = dma.done.wait [#allocation4], 512  }
  0x23   :  { %509 = vsyncadd [#allocation4], 4294966784 }
  0x24   :  { %510 = dma.done.wait [#allocation7], 1408  }
  0x25   :  { %511 = vsyncadd [#allocation7], 4294965888  ;;  %v56_v0 = vld [vmem:[#allocation3] sm:$0x3]  ;;  %v57_v3 = vld [vmem:[#allocation3 + $0x2] sm:$0x3] }
  0x26   :  { %v72_v1 = vld [vmem:[#allocation6] sm:$0x3]  ;;  %v73_v4 = vld [vmem:[#allocation6 + $0x2] sm:$0x3]  ;;  %v58_v6 = vld [vmem:[#allocation3 + $0x4] sm:$0x3] }
  0x27   :  { %v80_v2 = vsub.f32 %v56_v0, %v72_v1  ;;  %v81_v5 = vsub.f32 %v57_v3, %v73_v4  ;;  %v74_v7 = vld [vmem:[#allocation6 + $0x4] sm:$0x3]  ;;  %v59_v9 = vld [vmem:[#allocation3 + $0x6] sm:$0x3]  ;;  %v60_v12 = vld [vmem:[#allocation3 + $0x8] sm:$0x3] }
  0x28   :  { %v82_v8 = vsub.f32 %v58_v6, %v74_v7  ;;  %v75_v10 = vld [vmem:[#allocation6 + $0x6] sm:$0x3]  ;;  %v76_v13 = vld [vmem:[#allocation6 + $0x8] sm:$0x3]  ;;  %v558_v14 = vld [vmem:[#allocation8] sm:$0x3] }
  0x29   :  { %96 = vst [vmem:[#allocation2] sm:$0x3] %v80_v2  ;;  %97 = vst [vmem:[#allocation2 + $0x2] sm:$0x3] %v81_v5  ;;  %v83_v11 = vsub.f32 %v59_v9, %v75_v10  ;;  %v560_v15 = vld [vmem:[#allocation8 + $0x2] sm:$0x3]  ;;  %v84_v17 = vsub.f32 %v60_v12, %v76_v13 }
  0x2a   :  { %98 = vst [vmem:[#allocation2 + $0x4] sm:$0x3] %v82_v8  ;;  %v562_v16 = vld [vmem:[#allocation8 + $0x10] sm:$0x3]  ;;  %v564_v18 = vld [vmem:[#allocation8 + $0x4] sm:$0x3] }
  0x2b   :  { %99 = vst [vmem:[#allocation2 + $0x6] sm:$0x3] %v83_v11  ;;  %v566_v19 = vld [vmem:[#allocation8 + $0x12] sm:$0x3]  ;;  %v61_v20 = vld [vmem:[#allocation3 + $0xa] sm:$0x3] }
  0x2c   :  { %v77_v21 = vld [vmem:[#allocation6 + $0xa] sm:$0x3]  ;;  %v64_v22 = vld [vmem:[#allocation3 + $0x10] sm:$0x3]  ;;  %v568_v23 = vld [vmem:[#allocation8 + $0x1e] sm:$0x3] }
  0x2d   :  { %100 = vst [vmem:[#allocation2 + $0x8] sm:$0x3] %v84_v17  ;;  %v85_v24 = vsub.f32 %v61_v20, %v77_v21  ;;  %v88_v25 = vsub.f32 %v64_v22, %v72_v1  ;;  %v65_v26 = vld [vmem:[#allocation3 + $0x12] sm:$0x3]  ;;  %v66_v27 = vld [vmem:[#allocation3 + $0x14] sm:$0x3] }
  0x2e   :  { %v67_v28 = vld [vmem:[#allocation3 + $0x16] sm:$0x3]  ;;  %v574_v31 = vld [vmem:[#allocation8 + $0x14] sm:$0x3]  ;;  %v576_v32 = vld [vmem:[#allocation8 + $0x20] sm:$0x3]  ;;  %v89_v33 = vsub.f32 %v65_v26, %v73_v4  ;;  %v90_v34 = vsub.f32 %v66_v27, %v74_v7 }
  0x2f   :  { %v572_v30 = vld [vmem:[#allocation8 + $0x6] sm:$0x3]  ;;  %v91_v35 = vsub.f32 %v67_v28, %v75_v10  ;;  %v68_v36 = vld [vmem:[#allocation3 + $0x18] sm:$0x3]  ;;  %v69_v37 = vld [vmem:[#allocation3 + $0x1a] sm:$0x3] }
  0x30   :  { %v570_v29 = vld [vmem:[#allocation2] sm:$0x3]  ;;  %v580_v39 = vld [vmem:[#allocation2 + $0x2] sm:$0x3]  ;;  %101 = vst [vmem:[#allocation2 + $0xa] sm:$0x3] %v85_v24  ;;  %v92_v40 = vsub.f32 %v68_v36, %v76_v13  ;;  %v93_v41 = vsub.f32 %v69_v37, %v77_v21 }
  0x31   :  { %v115_v38 = vmul.f32 %v558_v14, %v570_v29  ;;  %104 = vst [vmem:[#allocation2 + $0x10] sm:$0x3] %v88_v25  ;;  %v62_v42 = vld [vmem:[#allocation3 + $0xc] sm:$0x3]  ;;  %v124_v44 = vmul.f32 %v580_v39, %v560_v15  ;;  %v188_v45 = vmul.f32 %v562_v16, %v580_v39  ;;  %v586_v46 = vld [vmem:[#allocation2 + $0x4] sm:$0x3] }
  0x32   :  { %v78_v43 = vld [vmem:[#allocation6 + $0xc] sm:$0x3]  ;;  %105 = vst [vmem:[#allocation2 + $0x12] sm:$0x3] %v89_v33  ;;  %106 = vst [vmem:[#allocation2 + $0x14] sm:$0x3] %v90_v34  ;;  %v133_v50 = vmul.f32 %v586_v46, %v564_v18  ;;  %v194_v51 = vmul.f32 %v566_v19, %v586_v46  ;;  %v234_v57 = vmul.f32 %v568_v23, %v586_v46 }
  0x33   :  { %107 = vst [vmem:[#allocation2 + $0x16] sm:$0x3] %v91_v35  ;;  %v86_v47 = vsub.f32 %v62_v42, %v78_v43  ;;  %v70_v48 = vld [vmem:[#allocation3 + $0x1c] sm:$0x3]  ;;  %v63_v49 = vld [vmem:[#allocation3 + $0xe] sm:$0x3]  ;;  %v126_v56 = vadd.f32 %v124_v44, %v115_v38 }
  0x34   :  { %v273_v52 = vld [vmem:[#allocation8 + $0x2a] sm:$0x3]  ;;  %108 = vst [vmem:[#allocation2 + $0x18] sm:$0x3] %v92_v40  ;;  %109 = vst [vmem:[#allocation2 + $0x1a] sm:$0x3] %v93_v41  ;;  %v94_v53 = vsub.f32 %v70_v48, %v78_v43  ;;  %v196_v63 = vadd.f32 %v194_v51, %v188_v45 }
  0x35   :  { %v79_v54 = vld [vmem:[#allocation6 + $0xe] sm:$0x3]  ;;  %v71_v55 = vld [vmem:[#allocation3 + $0x1e] sm:$0x3]  ;;  %v594_v58 = vld [vmem:[#allocation2 + $0x6] sm:$0x3]  ;;  %v135_v5 = vadd.f32 %v133_v50, %v126_v56 }
  0x36   :  { %v147_v59 = vld [vmem:[#allocation8 + $0x8] sm:$0x3]  ;;  %v205_v60 = vld [vmem:[#allocation8 + $0x16] sm:$0x3]  ;;  %102 = vst [vmem:[#allocation2 + $0xc] sm:$0x3] %v86_v47  ;;  %v87_v61 = vsub.f32 %v63_v49, %v79_v54  ;;  %v95_v62 = vsub.f32 %v71_v55, %v79_v54  ;;  %v142_v0 = vmul.f32 %v594_v58, %v572_v30  ;;  %v200_v1 = vmul.f32 %v574_v31, %v594_v58 }
  0x37   :  { %v240_v2 = vmul.f32 %v576_v32, %v594_v58  ;;  %v245_v3 = vld [vmem:[#allocation8 + $0x22] sm:$0x3]  ;;  %v279_v4 = vld [vmem:[#allocation8 + $0x2c] sm:$0x3]  ;;  %110 = vst [vmem:[#allocation2 + $0x1c] sm:$0x3] %v94_v53  ;;  %v609_v10 = vmul.f32 %v273_v52, %v594_v58 }
  0x38   :  { %v602_v6 = vld [vmem:[#allocation2 + $0x8] sm:$0x3]  ;;  %103 = vst [vmem:[#allocation2 + $0xe] sm:$0x3] %v87_v61  ;;  %111 = vst [vmem:[#allocation2 + $0x1e] sm:$0x3] %v95_v62  ;;  %v202_v9 = vadd.f32 %v200_v1, %v196_v63  ;;  %v144_v13 = vadd.f32 %v142_v0, %v135_v5 }
  0x39   :  { %v604_v7 = vld [vmem:[#allocation8 + $0xa] sm:$0x3]  ;;  %v606_v8 = vld [vmem:[#allocation8 + $0x18] sm:$0x3]  ;;  %v151_v11 = vmul.f32 %v602_v6, %v147_v59  ;;  %v206_v12 = vmul.f32 %v205_v60, %v602_v6  ;;  %v242_v17 = vadd.f32 %v240_v2, %v234_v57  ;;  %v246_v20 = vmul.f32 %v245_v3, %v602_v6  ;;  %v615_v22 = vld [vmem:[#allocation2 + $0xa] sm:$0x3] }
  0x3a   :  { %v280_v21 = vmul.f32 %v279_v4, %v602_v6  ;;  %v617_v24 = vld [vmem:[#allocation2 + $0x10] sm:$0x3]  ;;  %v621_v27 = vld [vmem:[#allocation2 + $0x12] sm:$0x3]  ;;  %v623_v28 = vld [vmem:[#allocation2 + $0x14] sm:$0x3]  ;;  %v160_v34 = vmul.f32 %v615_v22, %v604_v7  ;;  %v212_v35 = vmul.f32 %v606_v8, %v615_v22 }
  0x3b   :  { %v208_v25 = vadd.f32 %v206_v12, %v202_v9  ;;  %v116_v26 = vmul.f32 %v558_v14, %v617_v24  ;;  %v625_v33 = vld [vmem:[#allocation2 + $0x16] sm:$0x3]  ;;  %v153_v36 = vadd.f32 %v151_v11, %v144_v13  ;;  %v125_v37 = vmul.f32 %v621_v27, %v560_v15  ;;  %v637_v40 = vld [vmem:[#allocation2 + $0x18] sm:$0x3]  ;;  %v647_v44 = vld [vmem:[#allocation8 + $0xc] sm:$0x3] }
  0x3c   :  { %v189_v38 = vmul.f32 %v562_v16, %v621_v27  ;;  %v134_v14 = vmul.f32 %v623_v28, %v564_v18  ;;  %v195_v41 = vmul.f32 %v566_v19, %v623_v28  ;;  %v235_v42 = vmul.f32 %v568_v23, %v623_v28  ;;  %v655_v47 = vld [vmem:[#allocation8 + $0xe] sm:$0x3]  ;;  %v657_v23 = vld [vmem:[#allocation8 + $0x1a] sm:$0x3]  ;;  %v676_v56 = vld [vmem:[#allocation8 + $0x24] sm:$0x3] }
  0x3d   :  { %v143_v43 = vmul.f32 %v625_v33, %v572_v30  ;;  %v201_v15 = vmul.f32 %v574_v31, %v625_v33  ;;  %v127_v16 = vadd.f32 %v125_v37, %v116_v26  ;;  %v241_v18 = vmul.f32 %v576_v32, %v625_v33  ;;  %v666_v50 = vld [vmem:[#allocation2 + $0xc] sm:$0x3]  ;;  %v678_v57 = vld [vmem:[#allocation8 + $0x26] sm:$0x3]  ;;  %v684_v63 = vld [vmem:[#allocation8 + $0x28] sm:$0x3] }
  0x3e   :  { %v652_v45 = vmul.f32 %v273_v52, %v625_v33  ;;  %v152_v19 = vmul.f32 %v637_v40, %v147_v59  ;;  %v197_v48 = vadd.f32 %v195_v41, %v189_v38  ;;  %v207_v30 = vmul.f32 %v205_v60, %v637_v40  ;;  %v668_v32 = vld [vmem:[#allocation8 + $0x1c] sm:$0x3]  ;;  %v690_v5 = vld [vmem:[#allocation8 + $0x30] sm:$0x3]  ;;  %v700_v26 = vld [vmem:[#allocation8 + $0x34] sm:$0x3] }
  0x3f   :  { %v661_v31 = vmul.f32 %v245_v3, %v637_v40  ;;  %v664_v49 = vmul.f32 %v279_v4, %v637_v40  ;;  %v136_v51 = vadd.f32 %v134_v14, %v127_v16  ;;  %v670_v52 = vadd.f32 %v241_v18, %v235_v42  ;;  %v672_v53 = vld [vmem:[#allocation2 + $0xe] sm:$0x3]  ;;  %v688_v4 = vld [vmem:[#allocation8 + $0x2e] sm:$0x3]  ;;  %v707_v37 = vld [vmem:[#allocation8 + $0x38] sm:$0x3] }
  0x40   :  { %v162_v54 = vadd.f32 %v160_v34, %v153_v36  ;;  %v169_v55 = vmul.f32 %v666_v50, %v647_v44  ;;  %v203_v59 = vadd.f32 %v201_v15, %v197_v48  ;;  %v178_v60 = vmul.f32 %v672_v53, %v655_v47  ;;  %v702_v34 = vld [vmem:[#allocation8 + $0x36] sm:$0x3]  ;;  %v715_v15 = vld [vmem:[#allocation8 + $0x3c] sm:$0x3]  ;;  %v717_v16 = vld [vmem:[#allocation8 + $0x3e] sm:$0x3] }
  0x41   :  { %v214_v61 = vadd.f32 %v212_v35, %v208_v25  ;;  %v218_v62 = vmul.f32 %v657_v23, %v666_v50  ;;  %v145_v0 = vadd.f32 %v143_v43, %v136_v51  ;;  %v224_v2 = vmul.f32 %v668_v32, %v672_v53  ;;  %v698_v25 = vld [vmem:[#allocation8 + $0x32] sm:$0x3]  ;;  %v713_v43 = vld [vmem:[#allocation8 + $0x3a] sm:$0x3]  ;;  %v726_v48 = vld [vmem:[#allocation8 + $0x40] sm:$0x3] }
  0x42   :  { %v171_v1 = vadd.f32 %v169_v55, %v162_v54  ;;  %v248_v3 = vadd.f32 %v246_v20, %v242_v17  ;;  %v692_v9 = vadd.f32 %v207_v30, %v203_v59  ;;  %v252_v12 = vmul.f32 %v676_v56, %v615_v22  ;;  %v731_v59 = vld [vmem:[#allocation8 + $0x42] sm:$0x3]  ;;  %s519_s0 = smov [#allocation9]  }
  0x43   :  { %v220_v11 = vadd.f32 %v218_v62, %v214_v61  ;;  %v258_v13 = vmul.f32 %v678_v57, %v666_v50  ;;  %v154_v17 = vadd.f32 %v152_v19, %v145_v0  ;;  %v264_v35 = vmul.f32 %v684_v63, %v672_v53  ;;  %s405_s2 = sshll.u32 %s519_s0, 4  ;;  %s406_s2 = int_to_ptr.vmem [resolvable:$true] %s405_s2 }
  0x44   :  { %v180_v20 = vadd.f32 %v178_v60, %v171_v1  ;;  %v282_v36 = vadd.f32 %v280_v21, %v609_v10  ;;  %v254_v14 = vadd.f32 %v252_v12, %v248_v3  ;;  %v286_v41 = vmul.f32 %v688_v4, %v615_v22  ;;  %v745_v12 = vld [vmem:[#allocation2 + $0x1a] sm:$0x3]  ;;  %s488_s28 = scalar_lea.vmem %s406_s2, 64  ;;  %p493_p2 = scmp.lt.s32.totalorder %s406_s2, %s406_s2 }
  0x45   :  { %v226_v38 = vadd.f32 %v224_v2, %v220_v11  ;;  %v292_v42 = vmul.f32 %v690_v5, %v666_v50  ;;  %v298_v10 = vmul.f32 %v698_v25, %v672_v53  ;;  %v308_v21 = vmul.f32 %v700_v26, %v602_v6  ;;  %p489_p1 = scmp.ne.s32.totalorder %s406_s2, %s488_s28  ;;  %p494_p3 = scmp.lt.s32.totalorder %s488_s28, %s488_s28 }
  0x46   :  { %v182_v18 = vmul.f32 %v180_v20, %v570_v29  ;;  %v314_v19 = vmul.f32 %v702_v34, %v615_v22  ;;  %v260_v51 = vadd.f32 %v258_v13, %v254_v14  ;;  %v288_v54 = vadd.f32 %v286_v41, %v282_v36  ;;  %v733_v29 = vld [vmem:[#allocation8 + $0x44] sm:$0x3]  ;;  %v751_v14 = vld [vmem:[#allocation2 + $0x1c] sm:$0x3] }
  0x47   :  { %v228_v30 = vmul.f32 %v226_v38, %v580_v39  ;;  %v320_v55 = vmul.f32 %v707_v37, %v666_v50  ;;  %v326_v61 = vmul.f32 %v713_v43, %v672_v53  ;;  %v336_v62 = vmul.f32 %v715_v15, %v615_v22  ;;  %v741_v39 = vld [vmem:[#allocation8 + $0x46] sm:$0x3]  ;;  %p495_p4 = por %p494_p3, %p493_p2 }
  0x48   :  { %v316_v60 = vadd.f32 %v314_v19, %v308_v21  ;;  %v342_v0 = vmul.f32 %v717_v16, %v666_v50  ;;  %v266_v2 = vadd.f32 %v264_v35, %v260_v51  ;;  %v294_v3 = vadd.f32 %v292_v42, %v288_v54  ;;  %v760_v54 = vld [vmem:[#allocation2 + $0x1e] sm:$0x3] }
  0x49   :  { %v230_v1 = vadd.f32 %v228_v30, %v182_v18  ;;  %v348_v11 = vmul.f32 %v726_v48, %v672_v53  ;;  %v358_v36 = vmul.f32 %v731_v59, %v666_v50  ;;  %v364_v38 = vmul.f32 %v733_v29, %v672_v53  ;;  %p496_p5 = pnand %p495_p4, %p489_p1 }
  0x4a   :  { %v322_v13 = vadd.f32 %v320_v55, %v316_v60  ;;  %v344_v20 = vadd.f32 %v342_v0, %v336_v62  ;;  %v268_v41 = vmul.f32 %v266_v2, %v586_v46  ;;  %v300_v18 = vadd.f32 %v298_v10, %v294_v3 }
  0x4b   :  { %v374_v35 = vmul.f32 %v741_v39, %v672_v53  ;;  %v161_v42 = vmul.f32 %v745_v12, %v604_v7  ;;  %v366_v30 = vadd.f32 %v364_v38, %v358_v36  ;;  %v170_v51 = vmul.f32 %v751_v14, %v647_v44 }
  0x4c   :  { %v328_v21 = vadd.f32 %v326_v61, %v322_v13  ;;  %v350_v19 = vadd.f32 %v348_v11, %v344_v20  ;;  %v270_v55 = vadd.f32 %v268_v41, %v230_v1  ;;  %v302_v60 = vmul.f32 %v300_v18, %v594_v58 }
  0x4d   :  { %v378_v46 = vmul.f32 %v374_v35, %v672_v53  ;;  %v163_v10 = vadd.f32 %v161_v42, %v154_v17  ;;  %v368_v7 = vmul.f32 %v366_v30, %v666_v50  ;;  %v179_v61 = vmul.f32 %v760_v54, %v655_v47 }
  0x4e   :  { %v330_v62 = vmul.f32 %v328_v21, %v602_v6  ;;  %v352_v0 = vmul.f32 %v350_v19, %v615_v22  ;;  %v304_v2 = vadd.f32 %v302_v60, %v270_v55  ;;  %v213_v44 = vmul.f32 %v606_v8, %v745_v12 }
  0x4f   :  { %v172_v3 = vadd.f32 %v170_v51, %v163_v10  ;;  %v219_v58 = vmul.f32 %v657_v23, %v751_v14  ;;  %v225_v53 = vmul.f32 %v668_v32, %v760_v54  ;;  %v249_v6 = vadd.f32 %v661_v31, %v670_v52 }
  0x50   :  { %v253_v22 = vmul.f32 %v676_v56, %v745_v12  ;;  %v259_v47 = vmul.f32 %v678_v57, %v751_v14  ;;  %v332_v50 = vadd.f32 %v330_v62, %v304_v2  ;;  %v215_v1 = vadd.f32 %v213_v44, %v692_v9 }
  0x51   :  { %v181_v17 = vadd.f32 %v179_v61, %v172_v3  ;;  %v265_v8 = vmul.f32 %v684_v63, %v760_v54  ;;  %v283_v32 = vadd.f32 %v664_v49, %v652_v45  ;;  %v287_v31 = vmul.f32 %v688_v4, %v745_v12 }
  0x52   :  { %v255_v23 = vadd.f32 %v253_v22, %v249_v6  ;;  %v293_v52 = vmul.f32 %v690_v5, %v751_v14  ;;  %v354_v56 = vadd.f32 %v352_v0, %v332_v50  ;;  %v221_v11 = vadd.f32 %v219_v58, %v215_v1 }
  0x53   :  { %v183_v57 = vmul.f32 %v181_v17, %v617_v24  ;;  %v299_v9 = vmul.f32 %v698_v25, %v760_v54  ;;  %v289_v20 = vadd.f32 %v287_v31, %v283_v32  ;;  %v309_v63 = vmul.f32 %v700_v26, %v637_v40 }
  0x54   :  { %v261_v13 = vadd.f32 %v259_v47, %v255_v23  ;;  %v315_v45 = vmul.f32 %v702_v34, %v745_v12  ;;  %v370_v49 = vadd.f32 %v368_v7, %v354_v56  ;;  %v227_v4 = vadd.f32 %v225_v53, %v221_v11 }
  0x55   :  { %v321_v5 = vmul.f32 %v707_v37, %v751_v14  ;;  %v327_v24 = vmul.f32 %v713_v43, %v760_v54  ;;  %v295_v38 = vadd.f32 %v293_v52, %v289_v20  ;;  %v337_v25 = vmul.f32 %v715_v15, %v745_v12 }
  0x56   :  { %v267_v36 = vadd.f32 %v265_v8, %v261_v13  ;;  %v317_v41 = vadd.f32 %v315_v45, %v309_v63  ;;  %v380_v18 = vadd.f32 %v378_v46, %v370_v49  ;;  %v229_v26 = vmul.f32 %v227_v4, %v621_v27 }
  0x57   :  { %v343_v34 = vmul.f32 %v717_v16, %v751_v14  ;;  %v301_v35 = vadd.f32 %v299_v9, %v295_v38  ;;  %v349_v37 = vmul.f32 %v726_v48, %v760_v54  ;;  %v359_v15 = vmul.f32 %v731_v59, %v751_v14 }
  0x58   :  { %v323_v42 = vadd.f32 %v321_v5, %v317_v41  ;;  %v382_v21 = vmax.f32 %v380_v18, 0.0  ;;  %v231_v19 = vadd.f32 %v229_v26, %v183_v57  ;;  %v269_v30 = vmul.f32 %v267_v36, %v623_v28 }
  0x59   :  { %v345_v43 = vadd.f32 %v343_v34, %v337_v25  ;;  %v365_v27 = vmul.f32 %v733_v29, %v760_v54  ;;  %v303_v16 = vmul.f32 %v301_v35, %v625_v33  ;;  %v375_v28 = vmul.f32 %v741_v39, %v760_v54 }
  0x5a   :  { %v329_v51 = vadd.f32 %v327_v24, %v323_v42  ;;  %424 = vrsqrt.f32 %v382_v21  ;;  %v271_v55 = vadd.f32 %v269_v30, %v231_v19  ;;  %vm386_vm0 = vcmp.eq.f32.partialorder %v382_v21, inf }
  0x5b   :  { %v351_v60 = vadd.f32 %v349_v37, %v345_v43  ;;  %v367_v10 = vadd.f32 %v365_v27, %v359_v15  ;;  %v379_v29 = vmul.f32 %v375_v28, %v760_v54  ;;  %v389_v58 = vand.u32 2147483648, %v382_v21 }
  0x5c   :  { %v305_v46 = vadd.f32 %v303_v16, %v271_v55  ;;  %v331_v48 = vmul.f32 %v329_v51, %v637_v40  ;;  %vm388_vm1 = vcmp.eq.f32.partialorder %v382_v21, 0.0 }
  0x5d   :  { %v353_v0 = vmul.f32 %v351_v60, %v745_v12  ;;  %v369_v59 = vmul.f32 %v367_v10, %v751_v14 }
  0x5e   :  { %v333_v62 = vadd.f32 %v331_v48, %v305_v46 }
  0x60   :  { %v355_v7 = vadd.f32 %v353_v0, %v333_v62 }
  0x62   :  { %v371_v61 = vadd.f32 %v369_v59, %v355_v7 }
  0x64   :  { %v381_v2 = vadd.f32 %v379_v29, %v371_v61 }
  0x66   :  { %v383_v33 = vmax.f32 %v381_v2, 0.0 }
  0x67   :  { %v425_v3 = vpop.eup %424 }
  0x68   :  { %v385_v44 = vmul.f32 %v425_v3, %v382_v21  ;;  %426 = vrsqrt.f32 %v383_v33  ;;  %vm393_vm2 = vcmp.eq.f32.partialorder %v383_v33, inf  ;;  %v396_v14 = vand.u32 2147483648, %v383_v33 }
  0x69   :  { %vm395_vm3 = vcmp.eq.f32.partialorder %v383_v33, 0.0 }
  0x6a   :  { %v387_v40 = vsel %vm386_vm0, %v382_v21, %v385_v44 }
  0x6b   :  { %v390_v53 = vsel %vm388_vm1, %v389_v58, %v387_v40 }
  0x6c   :  { %398 = vst [vmem:[#allocation9] sm:$0x3] %v390_v53 }
  0x75   :  { %v427_v12 = vpop.eup %426 }
  0x76   :  { %v392_v39 = vmul.f32 %v427_v12, %v383_v33 }
  0x78   :  { %v394_v6 = vsel %vm393_vm2, %v383_v33, %v392_v39 }
  0x79   :  { %v397_v54 = vsel %vm395_vm3, %v396_v14, %v394_v6 }
  0x7a   :  { %399 = vst [vmem:[#allocation9 + $0x2] sm:$0x3] %v397_v54 }
  0x7b   :  { %499 = shalt.err (!%p496_p5)
}
  0x7c   :  { %411 = dma.vmem_to_hbm [thread:$0]  %s406_s2, 64, %s829_s3, [#allocation5], %s516_s17, %s516_s17, %s517_s18  }
  0x7d   :  { %512 = dma.done.wait [#allocation5], 64  }
  0x7e   :  { %513 = vsyncadd [#allocation5], 4294967232 }
  0x7f   :  { %415 = vsyncpa [#allocation4], 1 }
  0x80   :  { %416 = vsyncpa [#allocation7], 1 }
  0x81   :  { %417 = vsyncpa [#allocation5], 1 }

</bundles_post_ra>
